<compile_context>
chip_gen: v6e
topology: v6e:2x2x1
jax: 0.10.0
libtpu: 0.0.40
codegen_flags: <defaults>
</compile_context>

<pallas_src>
import functools

import jax
import jax.numpy as jnp
import numpy as np
from jax import lax
from jax.experimental import pallas as pl
from jax.experimental.pallas import tpu as pltpu

# ---- hyperparameters (hp) ----
NZ = 16            # hp.Nz
HID = 32           # hp.dec_hidden_size
M = 4              # hp.M
NMAX = 7           # hp.Nmax -> training seq len = Nmax + 1
BATCH = 2
SEQ = NMAX + 1
IN_DIM = 5 + NZ    # 21
IN_PAD = 32        # contraction dim padded to a sublane-tidy multiple of 8
NOUT = 6 * M + 3   # 27
LANE = 128         # TPU lane width; 4 packed gates of width HID fill one slab
BP = 8             # sublane-padded per-group batch (one (8,128) tile)


def decoder_kernel(S, H, Mm,
                   inputs_ref, z_ref,
                   w_hc_ref, b_hc_ref,
                   w_ih_ref, b_ih_ref, w_hh_ref,
                   w_fp_ref, b_fp_ref,
                   y_ref, hid_ref, cell_ref,
                   gx_sc, hall_sc):
    # ---- init (h, c) from z via fc_hc ----
    hc = jnp.tanh(
        jnp.dot(z_ref[0], w_hc_ref[...], preferred_element_type=jnp.float32)
        + b_hc_ref[...])                                    # (BP, 2H)
    h0 = hc[:, 0:H]
    c0 = hc[:, H:2 * H]

    # ---- hoisted input->gates matmul for ALL timesteps (packed gate slab) ----
    gx_sc[...] = (
        jnp.dot(inputs_ref[0], w_ih_ref[...],
                preferred_element_type=jnp.float32) + b_ih_ref[...])

    w_hh = w_hh_ref[...]                                    # loop-invariant (H, 4H)

    # ---- serial LSTM recurrence: 1 packed MXU push + 1 packed tanh per step --
    def step(t, carry):
        h, c = carry
        off = pl.multiple_of(t * BP, BP)                    # 8-aligned sublanes
        gates = gx_sc[pl.ds(off, BP), :] + jnp.dot(
            h, w_hh, preferred_element_type=jnp.float32)    # (BP, 4H) prescaled
        tg = jnp.tanh(gates)                                # single EUP pass
        # gate order i | f | g | o; sigmoid via 0.5*(tanh(0.5x)+1) with the 0.5
        # prescale already folded into the weights/bias at prepare time.
        i_g = 0.5 * (tg[:, 0:H] + 1.0)
        f_g = 0.5 * (tg[:, H:2 * H] + 1.0)
        g_g = tg[:, 2 * H:3 * H]
        o_g = 0.5 * (tg[:, 3 * H:4 * H] + 1.0)
        c = f_g * c + i_g * g_g
        h = o_g * jnp.tanh(c)
        hall_sc[pl.ds(off, BP), :] = h
        return h, c

    h, c = lax.fori_loop(0, S, step, (h0, c0), unroll=True)
    hid_ref[0] = h
    cell_ref[0] = c

    # ---- output head: one matmul + one merged activation pass ----
    y = (jnp.dot(hall_sc[...], w_fp_ref[...],
                 preferred_element_type=jnp.float32) + b_fp_ref[...])  # (S*BP, 128)
    col = lax.broadcasted_iota(jnp.int32, y.shape, 1)
    is_pi = col < Mm
    is_sigma = (col >= 3 * Mm) & (col < 5 * Mm)
    is_rho = (col >= 5 * Mm) & (col < 6 * Mm)
    is_q = (col >= 6 * Mm) & (col < 6 * Mm + 3)

    neg = jnp.float32(-1e30)
    pi_max = jnp.max(jnp.where(is_pi, y, neg), axis=-1, keepdims=True)
    q_max = jnp.max(jnp.where(is_q, y, neg), axis=-1, keepdims=True)
    # ONE exp over the whole slab: shift = group max on softmax lanes, 0 on
    # sigma lanes, y itself elsewhere (exp(0)=1, value unused there).
    shift = jnp.where(is_pi, pi_max,
                      jnp.where(is_q, q_max,
                                jnp.where(is_sigma, 0.0, y)))
    e = jnp.exp(y - shift)
    pi_sum = jnp.sum(jnp.where(is_pi, e, 0.0), axis=-1, keepdims=True)
    q_sum = jnp.sum(jnp.where(is_q, e, 0.0), axis=-1, keepdims=True)
    out = jnp.where(is_pi, e / pi_sum,
          jnp.where(is_q, e / q_sum,
          jnp.where(is_sigma, e,
          jnp.where(is_rho, jnp.tanh(y), y))))
    y_ref[0] = out


def prepare_decoder_params(params):
    """One-time host-side re-layout of PyTorch-layout params into kernel layout.

    * Weights transposed to (in, out).
    * LSTM gates packed into one 128-lane slab [i | f | g | o] (each HID lanes);
      the 0.5 prescale of sigmoid(x)=0.5*(tanh(x/2)+1) is folded into the
      i/f/o weight columns and bias so the kernel does a single tanh per step.
    * fc_params columns permuted to grouped order
      [pi | mu_x | mu_y | sigma_x | sigma_y | rho | q], zero-padded to 128.
    * IN_DIM padded to 32 rows for a sublane-tidy contraction.
    """
    w_hc, b_hc, w_ih, b_ih, w_hh, b_hh, w_fp, b_fp = [
        np.asarray(p, np.float32) for p in params]
    H = HID

    # fc_hc: hidden in cols [0:H], cell in cols [H:2H]
    w_hc_k = np.ascontiguousarray(w_hc.T)                   # (NZ, 2H)
    b_hc_k = b_hc.reshape(1, 2 * H).copy()

    gate_scale = (0.5, 0.5, 1.0, 0.5)                       # i, f, g, o
    w_ih_t = w_ih.T                                         # (IN_DIM, 4H)
    w_hh_t = w_hh.T                                         # (H, 4H)
    b_comb = b_ih + b_hh
    w_ih_k = np.zeros((IN_PAD, 4 * H), np.float32)
    w_hh_k = np.zeros((H, 4 * H), np.float32)
    b_ih_k = np.zeros((1, 4 * H), np.float32)
    for j, s in enumerate(gate_scale):
        w_ih_k[:IN_DIM, j * H:(j + 1) * H] = s * w_ih_t[:, j * H:(j + 1) * H]
        w_hh_k[:, j * H:(j + 1) * H] = s * w_hh_t[:, j * H:(j + 1) * H]
        b_ih_k[0, j * H:(j + 1) * H] = s * b_comb[j * H:(j + 1) * H]

    perm = np.array([6 * j + k for k in range(6) for j in range(M)]
                    + [6 * M, 6 * M + 1, 6 * M + 2])
    w_fp_g = w_fp.T[:, perm]                                # (H, NOUT)
    b_fp_g = b_fp[perm]
    w_fp_k = np.zeros((H, LANE), np.float32)
    b_fp_k = np.zeros((1, LANE), np.float32)
    w_fp_k[:, :NOUT] = w_fp_g
    b_fp_k[0, :NOUT] = b_fp_g

    return tuple(jnp.asarray(a) for a in
                 (w_hc_k, b_hc_k, w_ih_k, b_ih_k, w_hh_k, w_fp_k, b_fp_k))


@jax.jit
def decoder_forward(inputs, z, kparams):
    """inputs: (S, B, 5+Nz) seq-major, z: (B, Nz); kparams from prepare_*()."""
    S, B, F = inputs.shape
    G = pl.cdiv(B, BP)            # batch groups of 8 (parallel grid axis)
    BPAD = G * BP

    # sublane-pad batch to a multiple of 8 and features to 32 (free, XLA-side)
    x = jnp.zeros((S, BPAD, IN_PAD), jnp.float32).at[:, :B, :F].set(inputs)
    # (G, S*8, IN_PAD): within a group, row index = t*8 + local_batch
    x = x.reshape(S, G, BP, IN_PAD).transpose(1, 0, 2, 3).reshape(G, S * BP, IN_PAD)
    zp = jnp.zeros((BPAD, NZ), jnp.float32).at[:B].set(z).reshape(G, BP, NZ)

    vmem = lambda: pl.BlockSpec(memory_space=pltpu.MemorySpace.VMEM)
    kernel = functools.partial(decoder_kernel, S, HID, M)

    out_shape = (
        jax.ShapeDtypeStruct((G, S * BP, LANE), jnp.float32),   # packed head out
        jax.ShapeDtypeStruct((G, BP, HID), jnp.float32),        # final hidden
        jax.ShapeDtypeStruct((G, BP, HID), jnp.float32),        # final cell
    )
    y, h_p, c_p = pl.pallas_call(
        kernel,
        grid=(G,),
        out_shape=out_shape,
        in_specs=[
            pl.BlockSpec((1, S * BP, IN_PAD), lambda g: (g, 0, 0)),
            pl.BlockSpec((1, BP, NZ), lambda g: (g, 0, 0)),
            vmem(), vmem(), vmem(), vmem(), vmem(), vmem(), vmem(),
        ],
        out_specs=(
            pl.BlockSpec((1, S * BP, LANE), lambda g: (g, 0, 0)),
            pl.BlockSpec((1, BP, HID), lambda g: (g, 0, 0)),
            pl.BlockSpec((1, BP, HID), lambda g: (g, 0, 0)),
        ),
        scratch_shapes=[pltpu.VMEM((S * BP, LANE), jnp.float32),   # gates_x
                        pltpu.VMEM((S * BP, HID), jnp.float32)],   # h per step
        compiler_params=pltpu.CompilerParams(
            dimension_semantics=("parallel",)),
        cost_estimate=pl.CostEstimate(flops=2_000_000,
                                      transcendentals=30_000,
                                      bytes_accessed=300_000),
    )(x, zp, *kparams)

    # Free wrapper-side slicing of the lane-dense packed output.
    y = y.reshape(G, S, BP, LANE).transpose(1, 0, 2, 3).reshape(S, BPAD, LANE)
    y = y[:, :B]
    pi = y[..., 0:M]
    mu_x = y[..., M:2 * M]
    mu_y = y[..., 2 * M:3 * M]
    sigma_x = y[..., 3 * M:4 * M]
    sigma_y = y[..., 4 * M:5 * M]
    rho_xy = y[..., 5 * M:6 * M]
    q = y[..., 6 * M:6 * M + 3]
    hidden = h_p.reshape(BPAD, HID)[:B][None]
    cell = c_p.reshape(BPAD, HID)[:B][None]
    return pi, mu_x, mu_y, sigma_x, sigma_y, rho_xy, q, hidden, cell


def decoder_reference(inputs, z, params):
    """Pure-JAX reference replicating the PyTorch training forward."""
    w_hc, b_hc, w_ih, b_ih, w_hh, b_hh, w_fp, b_fp = params
    S, B, _ = inputs.shape
    H = HID
    prec = lax.Precision.HIGHEST
    hc = jnp.tanh(jnp.dot(z, w_hc.T, precision=prec) + b_hc)
    h, c = hc[:, :H], hc[:, H:]
    outs = []
    for t in range(S):
        gates = (jnp.dot(inputs[t], w_ih.T, precision=prec) + b_ih
                 + jnp.dot(h, w_hh.T, precision=prec) + b_hh)
        i = jax.nn.sigmoid(gates[:, :H])
        f = jax.nn.sigmoid(gates[:, H:2 * H])
        g = jnp.tanh(gates[:, 2 * H:3 * H])
        o = jax.nn.sigmoid(gates[:, 3 * H:4 * H])
        c = f * c + i * g
        h = o * jnp.tanh(c)
        outs.append(h)
    outs = jnp.stack(outs)                                         # (S, B, H)
    y = jnp.dot(outs.reshape(-1, H), w_fp.T, precision=prec) + b_fp
    mix = y[:, :6 * M].reshape(-1, M, 6)
    pi = jax.nn.softmax(mix[:, :, 0], axis=1).reshape(S, B, M)
    mu_x = mix[:, :, 1].reshape(S, B, M)
    mu_y = mix[:, :, 2].reshape(S, B, M)
    sx = jnp.exp(mix[:, :, 3]).reshape(S, B, M)
    sy = jnp.exp(mix[:, :, 4]).reshape(S, B, M)
    rho = jnp.tanh(mix[:, :, 5]).reshape(S, B, M)
    q = jax.nn.softmax(y[:, 6 * M:], axis=1).reshape(S, B, 3)
    return pi, mu_x, mu_y, sx, sy, rho, q, h[None], c[None]


if __name__ == "__main__":
    key = jax.random.PRNGKey(0)
    ks = jax.random.split(key, 10)
    scale = 0.1
    w_hc = scale * jax.random.normal(ks[0], (2 * HID, NZ), jnp.float32)
    b_hc = scale * jax.random.normal(ks[1], (2 * HID,), jnp.float32)
    w_ih = scale * jax.random.normal(ks[2], (4 * HID, IN_DIM), jnp.float32)
    b_ih = scale * jax.random.normal(ks[3], (4 * HID,), jnp.float32)
    w_hh = scale * jax.random.normal(ks[4], (4 * HID, HID), jnp.float32)
    b_hh = scale * jax.random.normal(ks[5], (4 * HID,), jnp.float32)
    w_fp = scale * jax.random.normal(ks[6], (NOUT, HID), jnp.float32)
    b_fp = scale * jax.random.normal(ks[7], (NOUT,), jnp.float32)
    params = (w_hc, b_hc, w_ih, b_ih, w_hh, b_hh, w_fp, b_fp)

    inputs = jax.random.normal(ks[8], (SEQ, BATCH, IN_DIM), jnp.float32)
    z = jax.random.normal(ks[9], (BATCH, NZ), jnp.float32)

    kparams = prepare_decoder_params(params)   # one-time kernel-layout weights
    outs = jax.block_until_ready(decoder_forward(inputs, z, kparams))
    refs = decoder_reference(inputs, z, params)

    names = ["pi", "mu_x", "mu_y", "sigma_x", "sigma_y", "rho_xy", "q",
             "hidden", "cell"]
    for name, a, b in zip(names, outs, refs):
        assert a.shape == b.shape, (name, a.shape, b.shape)
        np.testing.assert_allclose(np.asarray(a), np.asarray(b),
                                   rtol=2e-3, atol=2e-3, err_msg=name)
    print("KERNEL_OK")
</pallas_src>

<mosaic_0001>
module attributes {stable_mosaic.version = 11 : i64} {
  func.func @decoder_kernel(%arg0: i32, %arg1: memref<1x64x32xf32, #tpu.memory_space<vmem>>, %arg2: memref<1x8x16xf32, #tpu.memory_space<vmem>>, %arg3: memref<16x64xf32, #tpu.memory_space<vmem>>, %arg4: memref<1x64xf32, #tpu.memory_space<vmem>>, %arg5: memref<32x128xf32, #tpu.memory_space<vmem>>, %arg6: memref<1x128xf32, #tpu.memory_space<vmem>>, %arg7: memref<32x128xf32, #tpu.memory_space<vmem>>, %arg8: memref<32x128xf32, #tpu.memory_space<vmem>>, %arg9: memref<1x128xf32, #tpu.memory_space<vmem>>, %arg10: memref<1x64x128xf32, #tpu.memory_space<vmem>>, %arg11: memref<1x8x32xf32, #tpu.memory_space<vmem>>, %arg12: memref<1x8x32xf32, #tpu.memory_space<vmem>>, %arg13: memref<64x128xf32, #tpu.memory_space<vmem>>, %arg14: memref<64x32xf32, #tpu.memory_space<vmem>>) attributes {dimension_semantics = [#tpu.dimension_semantics<parallel>], iteration_bounds = array<i64: 1>, scalar_prefetch = 0 : i64, scratch_operands = 2 : i64, tpu.core_type = #tpu.core_type<tc>, window_params = [{transform_indices = @transform_0, window_bounds = array<i64: 1, 64, 32>}, {transform_indices = @transform_1, window_bounds = array<i64: 1, 8, 16>}, {pipeline_mode = #tpu.pipeline_mode<synchronous>, transform_indices = @transform_2, window_bounds = array<i64: 16, 64>}, {pipeline_mode = #tpu.pipeline_mode<synchronous>, transform_indices = @transform_3, window_bounds = array<i64: 1, 64>}, {pipeline_mode = #tpu.pipeline_mode<synchronous>, transform_indices = @transform_4, window_bounds = array<i64: 32, 128>}, {pipeline_mode = #tpu.pipeline_mode<synchronous>, transform_indices = @transform_5, window_bounds = array<i64: 1, 128>}, {pipeline_mode = #tpu.pipeline_mode<synchronous>, transform_indices = @transform_6, window_bounds = array<i64: 32, 128>}, {pipeline_mode = #tpu.pipeline_mode<synchronous>, transform_indices = @transform_7, window_bounds = array<i64: 32, 128>}, {pipeline_mode = #tpu.pipeline_mode<synchronous>, transform_indices = @transform_8, window_bounds = array<i64: 1, 128>}, {transform_indices = @transform_9, window_bounds = array<i64: 1, 64, 128>}, {transform_indices = @transform_10, window_bounds = array<i64: 1, 8, 32>}, {transform_indices = @transform_11, window_bounds = array<i64: 1, 8, 32>}]} {
    %c0 = arith.constant 0 : index
    %c0_0 = arith.constant 0 : index
    %c0_1 = arith.constant 0 : index
    %0 = vector.load %arg2[%c0, %c0_0, %c0_1] : memref<1x8x16xf32, #tpu.memory_space<vmem>>, vector<1x8x16xf32>
    %1 = vector.shape_cast %0 : vector<1x8x16xf32> to vector<8x16xf32>
    %c0_2 = arith.constant 0 : index
    %c0_3 = arith.constant 0 : index
    %2 = vector.load %arg3[%c0_2, %c0_3] : memref<16x64xf32, #tpu.memory_space<vmem>>, vector<16x64xf32>
    %cst = arith.constant dense<0.000000e+00> : vector<8x64xf32>
    %3 = tpu.matmul %1, %2, %cst {dimension_numbers = #tpu.dot_dimension_numbers<[1], [0], [0], [1], [0, 0, 1, 1], [], []>} : vector<8x16xf32>, vector<16x64xf32>, vector<8x64xf32> -> vector<8x64xf32>
    %c0_4 = arith.constant 0 : index
    %c0_5 = arith.constant 0 : index
    %4 = vector.load %arg4[%c0_4, %c0_5] : memref<1x64xf32, #tpu.memory_space<vmem>>, vector<1x64xf32>
    %5 = vector.broadcast %4 : vector<1x64xf32> to vector<8x64xf32>
    %6 = arith.addf %3, %5 : vector<8x64xf32>
    %7 = math.tanh %6 : vector<8x64xf32>
    %8 = vector.extract_strided_slice %7 {offsets = [0, 0], sizes = [8, 32], strides = [1, 1]} : vector<8x64xf32> to vector<8x32xf32>
    %9 = vector.extract_strided_slice %7 {offsets = [0, 32], sizes = [8, 32], strides = [1, 1]} : vector<8x64xf32> to vector<8x32xf32>
    %c0_6 = arith.constant 0 : index
    %c0_7 = arith.constant 0 : index
    %c0_8 = arith.constant 0 : index
    %10 = vector.load %arg1[%c0_6, %c0_7, %c0_8] : memref<1x64x32xf32, #tpu.memory_space<vmem>>, vector<1x64x32xf32>
    %11 = vector.shape_cast %10 : vector<1x64x32xf32> to vector<64x32xf32>
    %c0_9 = arith.constant 0 : index
    %c0_10 = arith.constant 0 : index
    %12 = vector.load %arg5[%c0_9, %c0_10] : memref<32x128xf32, #tpu.memory_space<vmem>>, vector<32x128xf32>
    %cst_11 = arith.constant dense<0.000000e+00> : vector<64x128xf32>
    %13 = tpu.matmul %11, %12, %cst_11 {dimension_numbers = #tpu.dot_dimension_numbers<[1], [0], [0], [1], [0, 0, 1, 1], [], []>} : vector<64x32xf32>, vector<32x128xf32>, vector<64x128xf32> -> vector<64x128xf32>
    %c0_12 = arith.constant 0 : index
    %c0_13 = arith.constant 0 : index
    %14 = vector.load %arg6[%c0_12, %c0_13] : memref<1x128xf32, #tpu.memory_space<vmem>>, vector<1x128xf32>
    %15 = vector.broadcast %14 : vector<1x128xf32> to vector<64x128xf32>
    %16 = arith.addf %13, %15 : vector<64x128xf32>
    %c0_14 = arith.constant 0 : index
    %c0_15 = arith.constant 0 : index
    %17 = vector.load %arg13[%c0_14, %c0_15] : memref<64x128xf32, #tpu.memory_space<vmem>>, vector<64x128xf32>
    tpu.vector_store %arg13[%c0_14, %c0_15], %16 {strides = array<i32>} : memref<64x128xf32, #tpu.memory_space<vmem>>, vector<64x128xf32>,
    %c0_16 = arith.constant 0 : index
    %c0_17 = arith.constant 0 : index
    %18 = vector.load %arg7[%c0_16, %c0_17] : memref<32x128xf32, #tpu.memory_space<vmem>>, vector<32x128xf32>
    %c0_i32 = arith.constant 0 : i32
    %c8_i32 = arith.constant 8 : i32
    %19 = arith.muli %c0_i32, %c8_i32 : i32
    %20 = tpu.assume_multiple %19, 8 : i32
    %21 = arith.index_cast %20 : i32 to index
    %c0_18 = arith.constant 0 : index
    %22 = vector.load %arg13[%21, %c0_18] : memref<64x128xf32, #tpu.memory_space<vmem>>, vector<8x128xf32>
    %cst_19 = arith.constant dense<0.000000e+00> : vector<8x128xf32>
    %23 = tpu.matmul %8, %18, %cst_19 {dimension_numbers = #tpu.dot_dimension_numbers<[1], [0], [0], [1], [0, 0, 1, 1], [], []>} : vector<8x32xf32>, vector<32x128xf32>, vector<8x128xf32> -> vector<8x128xf32>
    %24 = arith.addf %22, %23 : vector<8x128xf32>
    %25 = math.tanh %24 : vector<8x128xf32>
    %26 = vector.extract_strided_slice %25 {offsets = [0, 0], sizes = [8, 32], strides = [1, 1]} : vector<8x128xf32> to vector<8x32xf32>
    %cst_20 = arith.constant 1.000000e+00 : f32
    %27 = vector.broadcast %cst_20 : f32 to vector<8x32xf32>
    %28 = arith.addf %26, %27 : vector<8x32xf32>
    %cst_21 = arith.constant 5.000000e-01 : f32
    %29 = vector.broadcast %cst_21 : f32 to vector<8x32xf32>
    %30 = arith.mulf %29, %28 : vector<8x32xf32>
    %31 = vector.extract_strided_slice %25 {offsets = [0, 32], sizes = [8, 32], strides = [1, 1]} : vector<8x128xf32> to vector<8x32xf32>
    %cst_22 = arith.constant 1.000000e+00 : f32
    %32 = vector.broadcast %cst_22 : f32 to vector<8x32xf32>
    %33 = arith.addf %31, %32 : vector<8x32xf32>
    %cst_23 = arith.constant 5.000000e-01 : f32
    %34 = vector.broadcast %cst_23 : f32 to vector<8x32xf32>
    %35 = arith.mulf %34, %33 : vector<8x32xf32>
    %36 = vector.extract_strided_slice %25 {offsets = [0, 64], sizes = [8, 32], strides = [1, 1]} : vector<8x128xf32> to vector<8x32xf32>
    %37 = vector.extract_strided_slice %25 {offsets = [0, 96], sizes = [8, 32], strides = [1, 1]} : vector<8x128xf32> to vector<8x32xf32>
    %cst_24 = arith.constant 1.000000e+00 : f32
    %38 = vector.broadcast %cst_24 : f32 to vector<8x32xf32>
    %39 = arith.addf %37, %38 : vector<8x32xf32>
    %cst_25 = arith.constant 5.000000e-01 : f32
    %40 = vector.broadcast %cst_25 : f32 to vector<8x32xf32>
    %41 = arith.mulf %40, %39 : vector<8x32xf32>
    %42 = arith.mulf %35, %9 : vector<8x32xf32>
    %43 = arith.mulf %30, %36 : vector<8x32xf32>
    %44 = arith.addf %42, %43 : vector<8x32xf32>
    %45 = math.tanh %44 : vector<8x32xf32>
    %46 = arith.mulf %41, %45 : vector<8x32xf32>
    %47 = arith.index_cast %20 : i32 to index
    %c0_26 = arith.constant 0 : index
    %48 = vector.load %arg14[%47, %c0_26] : memref<64x32xf32, #tpu.memory_space<vmem>>, vector<8x32xf32>
    tpu.vector_store %arg14[%47, %c0_26], %46 {strides = array<i32>} : memref<64x32xf32, #tpu.memory_space<vmem>>, vector<8x32xf32>,
    %c1_i32 = arith.constant 1 : i32
    %c8_i32_27 = arith.constant 8 : i32
    %49 = arith.muli %c1_i32, %c8_i32_27 : i32
    %50 = tpu.assume_multiple %49, 8 : i32
    %51 = arith.index_cast %50 : i32 to index
    %c0_28 = arith.constant 0 : index
    %52 = vector.load %arg13[%51, %c0_28] : memref<64x128xf32, #tpu.memory_space<vmem>>, vector<8x128xf32>
    %cst_29 = arith.constant dense<0.000000e+00> : vector<8x128xf32>
    %53 = tpu.matmul %46, %18, %cst_29 {dimension_numbers = #tpu.dot_dimension_numbers<[1], [0], [0], [1], [0, 0, 1, 1], [], []>} : vector<8x32xf32>, vector<32x128xf32>, vector<8x128xf32> -> vector<8x128xf32>
    %54 = arith.addf %52, %53 : vector<8x128xf32>
    %55 = math.tanh %54 : vector<8x128xf32>
    %56 = vector.extract_strided_slice %55 {offsets = [0, 0], sizes = [8, 32], strides = [1, 1]} : vector<8x128xf32> to vector<8x32xf32>
    %cst_30 = arith.constant 1.000000e+00 : f32
    %57 = vector.broadcast %cst_30 : f32 to vector<8x32xf32>
    %58 = arith.addf %56, %57 : vector<8x32xf32>
    %cst_31 = arith.constant 5.000000e-01 : f32
    %59 = vector.broadcast %cst_31 : f32 to vector<8x32xf32>
    %60 = arith.mulf %59, %58 : vector<8x32xf32>
    %61 = vector.extract_strided_slice %55 {offsets = [0, 32], sizes = [8, 32], strides = [1, 1]} : vector<8x128xf32> to vector<8x32xf32>
    %cst_32 = arith.constant 1.000000e+00 : f32
    %62 = vector.broadcast %cst_32 : f32 to vector<8x32xf32>
    %63 = arith.addf %61, %62 : vector<8x32xf32>
    %cst_33 = arith.constant 5.000000e-01 : f32
    %64 = vector.broadcast %cst_33 : f32 to vector<8x32xf32>
    %65 = arith.mulf %64, %63 : vector<8x32xf32>
    %66 = vector.extract_strided_slice %55 {offsets = [0, 64], sizes = [8, 32], strides = [1, 1]} : vector<8x128xf32> to vector<8x32xf32>
    %67 = vector.extract_strided_slice %55 {offsets = [0, 96], sizes = [8, 32], strides = [1, 1]} : vector<8x128xf32> to vector<8x32xf32>
    %cst_34 = arith.constant 1.000000e+00 : f32
    %68 = vector.broadcast %cst_34 : f32 to vector<8x32xf32>
    %69 = arith.addf %67, %68 : vector<8x32xf32>
    %cst_35 = arith.constant 5.000000e-01 : f32
    %70 = vector.broadcast %cst_35 : f32 to vector<8x32xf32>
    %71 = arith.mulf %70, %69 : vector<8x32xf32>
    %72 = arith.mulf %65, %44 : vector<8x32xf32>
    %73 = arith.mulf %60, %66 : vector<8x32xf32>
    %74 = arith.addf %72, %73 : vector<8x32xf32>
    %75 = math.tanh %74 : vector<8x32xf32>
    %76 = arith.mulf %71, %75 : vector<8x32xf32>
    %77 = arith.index_cast %50 : i32 to index
    %c0_36 = arith.constant 0 : index
    %78 = vector.load %arg14[%77, %c0_36] : memref<64x32xf32, #tpu.memory_space<vmem>>, vector<8x32xf32>
    tpu.vector_store %arg14[%77, %c0_36], %76 {strides = array<i32>} : memref<64x32xf32, #tpu.memory_space<vmem>>, vector<8x32xf32>,
    %c2_i32 = arith.constant 2 : i32
    %c8_i32_37 = arith.constant 8 : i32
    %79 = arith.muli %c2_i32, %c8_i32_37 : i32
    %80 = tpu.assume_multiple %79, 8 : i32
    %81 = arith.index_cast %80 : i32 to index
    %c0_38 = arith.constant 0 : index
    %82 = vector.load %arg13[%81, %c0_38] : memref<64x128xf32, #tpu.memory_space<vmem>>, vector<8x128xf32>
    %cst_39 = arith.constant dense<0.000000e+00> : vector<8x128xf32>
    %83 = tpu.matmul %76, %18, %cst_39 {dimension_numbers = #tpu.dot_dimension_numbers<[1], [0], [0], [1], [0, 0, 1, 1], [], []>} : vector<8x32xf32>, vector<32x128xf32>, vector<8x128xf32> -> vector<8x128xf32>
    %84 = arith.addf %82, %83 : vector<8x128xf32>
    %85 = math.tanh %84 : vector<8x128xf32>
    %86 = vector.extract_strided_slice %85 {offsets = [0, 0], sizes = [8, 32], strides = [1, 1]} : vector<8x128xf32> to vector<8x32xf32>
    %cst_40 = arith.constant 1.000000e+00 : f32
    %87 = vector.broadcast %cst_40 : f32 to vector<8x32xf32>
    %88 = arith.addf %86, %87 : vector<8x32xf32>
    %cst_41 = arith.constant 5.000000e-01 : f32
    %89 = vector.broadcast %cst_41 : f32 to vector<8x32xf32>
    %90 = arith.mulf %89, %88 : vector<8x32xf32>
    %91 = vector.extract_strided_slice %85 {offsets = [0, 32], sizes = [8, 32], strides = [1, 1]} : vector<8x128xf32> to vector<8x32xf32>
    %cst_42 = arith.constant 1.000000e+00 : f32
    %92 = vector.broadcast %cst_42 : f32 to vector<8x32xf32>
    %93 = arith.addf %91, %92 : vector<8x32xf32>
    %cst_43 = arith.constant 5.000000e-01 : f32
    %94 = vector.broadcast %cst_43 : f32 to vector<8x32xf32>
    %95 = arith.mulf %94, %93 : vector<8x32xf32>
    %96 = vector.extract_strided_slice %85 {offsets = [0, 64], sizes = [8, 32], strides = [1, 1]} : vector<8x128xf32> to vector<8x32xf32>
    %97 = vector.extract_strided_slice %85 {offsets = [0, 96], sizes = [8, 32], strides = [1, 1]} : vector<8x128xf32> to vector<8x32xf32>
    %cst_44 = arith.constant 1.000000e+00 : f32
    %98 = vector.broadcast %cst_44 : f32 to vector<8x32xf32>
    %99 = arith.addf %97, %98 : vector<8x32xf32>
    %cst_45 = arith.constant 5.000000e-01 : f32
    %100 = vector.broadcast %cst_45 : f32 to vector<8x32xf32>
    %101 = arith.mulf %100, %99 : vector<8x32xf32>
    %102 = arith.mulf %95, %74 : vector<8x32xf32>
    %103 = arith.mulf %90, %96 : vector<8x32xf32>
    %104 = arith.addf %102, %103 : vector<8x32xf32>
    %105 = math.tanh %104 : vector<8x32xf32>
    %106 = arith.mulf %101, %105 : vector<8x32xf32>
    %107 = arith.index_cast %80 : i32 to index
    %c0_46 = arith.constant 0 : index
    %108 = vector.load %arg14[%107, %c0_46] : memref<64x32xf32, #tpu.memory_space<vmem>>, vector<8x32xf32>
    tpu.vector_store %arg14[%107, %c0_46], %106 {strides = array<i32>} : memref<64x32xf32, #tpu.memory_space<vmem>>, vector<8x32xf32>,
    %c3_i32 = arith.constant 3 : i32
    %c8_i32_47 = arith.constant 8 : i32
    %109 = arith.muli %c3_i32, %c8_i32_47 : i32
    %110 = tpu.assume_multiple %109, 8 : i32
    %111 = arith.index_cast %110 : i32 to index
    %c0_48 = arith.constant 0 : index
    %112 = vector.load %arg13[%111, %c0_48] : memref<64x128xf32, #tpu.memory_space<vmem>>, vector<8x128xf32>
    %cst_49 = arith.constant dense<0.000000e+00> : vector<8x128xf32>
    %113 = tpu.matmul %106, %18, %cst_49 {dimension_numbers = #tpu.dot_dimension_numbers<[1], [0], [0], [1], [0, 0, 1, 1], [], []>} : vector<8x32xf32>, vector<32x128xf32>, vector<8x128xf32> -> vector<8x128xf32>
    %114 = arith.addf %112, %113 : vector<8x128xf32>
    %115 = math.tanh %114 : vector<8x128xf32>
    %116 = vector.extract_strided_slice %115 {offsets = [0, 0], sizes = [8, 32], strides = [1, 1]} : vector<8x128xf32> to vector<8x32xf32>
    %cst_50 = arith.constant 1.000000e+00 : f32
    %117 = vector.broadcast %cst_50 : f32 to vector<8x32xf32>
    %118 = arith.addf %116, %117 : vector<8x32xf32>
    %cst_51 = arith.constant 5.000000e-01 : f32
    %119 = vector.broadcast %cst_51 : f32 to vector<8x32xf32>
    %120 = arith.mulf %119, %118 : vector<8x32xf32>
    %121 = vector.extract_strided_slice %115 {offsets = [0, 32], sizes = [8, 32], strides = [1, 1]} : vector<8x128xf32> to vector<8x32xf32>
    %cst_52 = arith.constant 1.000000e+00 : f32
    %122 = vector.broadcast %cst_52 : f32 to vector<8x32xf32>
    %123 = arith.addf %121, %122 : vector<8x32xf32>
    %cst_53 = arith.constant 5.000000e-01 : f32
    %124 = vector.broadcast %cst_53 : f32 to vector<8x32xf32>
    %125 = arith.mulf %124, %123 : vector<8x32xf32>
    %126 = vector.extract_strided_slice %115 {offsets = [0, 64], sizes = [8, 32], strides = [1, 1]} : vector<8x128xf32> to vector<8x32xf32>
    %127 = vector.extract_strided_slice %115 {offsets = [0, 96], sizes = [8, 32], strides = [1, 1]} : vector<8x128xf32> to vector<8x32xf32>
    %cst_54 = arith.constant 1.000000e+00 : f32
    %128 = vector.broadcast %cst_54 : f32 to vector<8x32xf32>
    %129 = arith.addf %127, %128 : vector<8x32xf32>
    %cst_55 = arith.constant 5.000000e-01 : f32
    %130 = vector.broadcast %cst_55 : f32 to vector<8x32xf32>
    %131 = arith.mulf %130, %129 : vector<8x32xf32>
    %132 = arith.mulf %125, %104 : vector<8x32xf32>
    %133 = arith.mulf %120, %126 : vector<8x32xf32>
    %134 = arith.addf %132, %133 : vector<8x32xf32>
    %135 = math.tanh %134 : vector<8x32xf32>
    %136 = arith.mulf %131, %135 : vector<8x32xf32>
    %137 = arith.index_cast %110 : i32 to index
    %c0_56 = arith.constant 0 : index
    %138 = vector.load %arg14[%137, %c0_56] : memref<64x32xf32, #tpu.memory_space<vmem>>, vector<8x32xf32>
    tpu.vector_store %arg14[%137, %c0_56], %136 {strides = array<i32>} : memref<64x32xf32, #tpu.memory_space<vmem>>, vector<8x32xf32>,
    %c4_i32 = arith.constant 4 : i32
    %c8_i32_57 = arith.constant 8 : i32
    %139 = arith.muli %c4_i32, %c8_i32_57 : i32
    %140 = tpu.assume_multiple %139, 8 : i32
    %141 = arith.index_cast %140 : i32 to index
    %c0_58 = arith.constant 0 : index
    %142 = vector.load %arg13[%141, %c0_58] : memref<64x128xf32, #tpu.memory_space<vmem>>, vector<8x128xf32>
    %cst_59 = arith.constant dense<0.000000e+00> : vector<8x128xf32>
    %143 = tpu.matmul %136, %18, %cst_59 {dimension_numbers = #tpu.dot_dimension_numbers<[1], [0], [0], [1], [0, 0, 1, 1], [], []>} : vector<8x32xf32>, vector<32x128xf32>, vector<8x128xf32> -> vector<8x128xf32>
    %144 = arith.addf %142, %143 : vector<8x128xf32>
    %145 = math.tanh %144 : vector<8x128xf32>
    %146 = vector.extract_strided_slice %145 {offsets = [0, 0], sizes = [8, 32], strides = [1, 1]} : vector<8x128xf32> to vector<8x32xf32>
    %cst_60 = arith.constant 1.000000e+00 : f32
    %147 = vector.broadcast %cst_60 : f32 to vector<8x32xf32>
    %148 = arith.addf %146, %147 : vector<8x32xf32>
    %cst_61 = arith.constant 5.000000e-01 : f32
    %149 = vector.broadcast %cst_61 : f32 to vector<8x32xf32>
    %150 = arith.mulf %149, %148 : vector<8x32xf32>
    %151 = vector.extract_strided_slice %145 {offsets = [0, 32], sizes = [8, 32], strides = [1, 1]} : vector<8x128xf32> to vector<8x32xf32>
    %cst_62 = arith.constant 1.000000e+00 : f32
    %152 = vector.broadcast %cst_62 : f32 to vector<8x32xf32>
    %153 = arith.addf %151, %152 : vector<8x32xf32>
    %cst_63 = arith.constant 5.000000e-01 : f32
    %154 = vector.broadcast %cst_63 : f32 to vector<8x32xf32>
    %155 = arith.mulf %154, %153 : vector<8x32xf32>
    %156 = vector.extract_strided_slice %145 {offsets = [0, 64], sizes = [8, 32], strides = [1, 1]} : vector<8x128xf32> to vector<8x32xf32>
    %157 = vector.extract_strided_slice %145 {offsets = [0, 96], sizes = [8, 32], strides = [1, 1]} : vector<8x128xf32> to vector<8x32xf32>
    %cst_64 = arith.constant 1.000000e+00 : f32
    %158 = vector.broadcast %cst_64 : f32 to vector<8x32xf32>
    %159 = arith.addf %157, %158 : vector<8x32xf32>
    %cst_65 = arith.constant 5.000000e-01 : f32
    %160 = vector.broadcast %cst_65 : f32 to vector<8x32xf32>
    %161 = arith.mulf %160, %159 : vector<8x32xf32>
    %162 = arith.mulf %155, %134 : vector<8x32xf32>
    %163 = arith.mulf %150, %156 : vector<8x32xf32>
    %164 = arith.addf %162, %163 : vector<8x32xf32>
    %165 = math.tanh %164 : vector<8x32xf32>
    %166 = arith.mulf %161, %165 : vector<8x32xf32>
    %167 = arith.index_cast %140 : i32 to index
    %c0_66 = arith.constant 0 : index
    %168 = vector.load %arg14[%167, %c0_66] : memref<64x32xf32, #tpu.memory_space<vmem>>, vector<8x32xf32>
    tpu.vector_store %arg14[%167, %c0_66], %166 {strides = array<i32>} : memref<64x32xf32, #tpu.memory_space<vmem>>, vector<8x32xf32>,
    %c5_i32 = arith.constant 5 : i32
    %c8_i32_67 = arith.constant 8 : i32
    %169 = arith.muli %c5_i32, %c8_i32_67 : i32
    %170 = tpu.assume_multiple %169, 8 : i32
    %171 = arith.index_cast %170 : i32 to index
    %c0_68 = arith.constant 0 : index
    %172 = vector.load %arg13[%171, %c0_68] : memref<64x128xf32, #tpu.memory_space<vmem>>, vector<8x128xf32>
    %cst_69 = arith.constant dense<0.000000e+00> : vector<8x128xf32>
    %173 = tpu.matmul %166, %18, %cst_69 {dimension_numbers = #tpu.dot_dimension_numbers<[1], [0], [0], [1], [0, 0, 1, 1], [], []>} : vector<8x32xf32>, vector<32x128xf32>, vector<8x128xf32> -> vector<8x128xf32>
    %174 = arith.addf %172, %173 : vector<8x128xf32>
    %175 = math.tanh %174 : vector<8x128xf32>
    %176 = vector.extract_strided_slice %175 {offsets = [0, 0], sizes = [8, 32], strides = [1, 1]} : vector<8x128xf32> to vector<8x32xf32>
    %cst_70 = arith.constant 1.000000e+00 : f32
    %177 = vector.broadcast %cst_70 : f32 to vector<8x32xf32>
    %178 = arith.addf %176, %177 : vector<8x32xf32>
    %cst_71 = arith.constant 5.000000e-01 : f32
    %179 = vector.broadcast %cst_71 : f32 to vector<8x32xf32>
    %180 = arith.mulf %179, %178 : vector<8x32xf32>
    %181 = vector.extract_strided_slice %175 {offsets = [0, 32], sizes = [8, 32], strides = [1, 1]} : vector<8x128xf32> to vector<8x32xf32>
    %cst_72 = arith.constant 1.000000e+00 : f32
    %182 = vector.broadcast %cst_72 : f32 to vector<8x32xf32>
    %183 = arith.addf %181, %182 : vector<8x32xf32>
    %cst_73 = arith.constant 5.000000e-01 : f32
    %184 = vector.broadcast %cst_73 : f32 to vector<8x32xf32>
    %185 = arith.mulf %184, %183 : vector<8x32xf32>
    %186 = vector.extract_strided_slice %175 {offsets = [0, 64], sizes = [8, 32], strides = [1, 1]} : vector<8x128xf32> to vector<8x32xf32>
    %187 = vector.extract_strided_slice %175 {offsets = [0, 96], sizes = [8, 32], strides = [1, 1]} : vector<8x128xf32> to vector<8x32xf32>
    %cst_74 = arith.constant 1.000000e+00 : f32
    %188 = vector.broadcast %cst_74 : f32 to vector<8x32xf32>
    %189 = arith.addf %187, %188 : vector<8x32xf32>
    %cst_75 = arith.constant 5.000000e-01 : f32
    %190 = vector.broadcast %cst_75 : f32 to vector<8x32xf32>
    %191 = arith.mulf %190, %189 : vector<8x32xf32>
    %192 = arith.mulf %185, %164 : vector<8x32xf32>
    %193 = arith.mulf %180, %186 : vector<8x32xf32>
    %194 = arith.addf %192, %193 : vector<8x32xf32>
    %195 = math.tanh %194 : vector<8x32xf32>
    %196 = arith.mulf %191, %195 : vector<8x32xf32>
    %197 = arith.index_cast %170 : i32 to index
    %c0_76 = arith.constant 0 : index
    %198 = vector.load %arg14[%197, %c0_76] : memref<64x32xf32, #tpu.memory_space<vmem>>, vector<8x32xf32>
    tpu.vector_store %arg14[%197, %c0_76], %196 {strides = array<i32>} : memref<64x32xf32, #tpu.memory_space<vmem>>, vector<8x32xf32>,
    %c6_i32 = arith.constant 6 : i32
    %c8_i32_77 = arith.constant 8 : i32
    %199 = arith.muli %c6_i32, %c8_i32_77 : i32
    %200 = tpu.assume_multiple %199, 8 : i32
    %201 = arith.index_cast %200 : i32 to index
    %c0_78 = arith.constant 0 : index
    %202 = vector.load %arg13[%201, %c0_78] : memref<64x128xf32, #tpu.memory_space<vmem>>, vector<8x128xf32>
    %cst_79 = arith.constant dense<0.000000e+00> : vector<8x128xf32>
    %203 = tpu.matmul %196, %18, %cst_79 {dimension_numbers = #tpu.dot_dimension_numbers<[1], [0], [0], [1], [0, 0, 1, 1], [], []>} : vector<8x32xf32>, vector<32x128xf32>, vector<8x128xf32> -> vector<8x128xf32>
    %204 = arith.addf %202, %203 : vector<8x128xf32>
    %205 = math.tanh %204 : vector<8x128xf32>
    %206 = vector.extract_strided_slice %205 {offsets = [0, 0], sizes = [8, 32], strides = [1, 1]} : vector<8x128xf32> to vector<8x32xf32>
    %cst_80 = arith.constant 1.000000e+00 : f32
    %207 = vector.broadcast %cst_80 : f32 to vector<8x32xf32>
    %208 = arith.addf %206, %207 : vector<8x32xf32>
    %cst_81 = arith.constant 5.000000e-01 : f32
    %209 = vector.broadcast %cst_81 : f32 to vector<8x32xf32>
    %210 = arith.mulf %209, %208 : vector<8x32xf32>
    %211 = vector.extract_strided_slice %205 {offsets = [0, 32], sizes = [8, 32], strides = [1, 1]} : vector<8x128xf32> to vector<8x32xf32>
    %cst_82 = arith.constant 1.000000e+00 : f32
    %212 = vector.broadcast %cst_82 : f32 to vector<8x32xf32>
    %213 = arith.addf %211, %212 : vector<8x32xf32>
    %cst_83 = arith.constant 5.000000e-01 : f32
    %214 = vector.broadcast %cst_83 : f32 to vector<8x32xf32>
    %215 = arith.mulf %214, %213 : vector<8x32xf32>
    %216 = vector.extract_strided_slice %205 {offsets = [0, 64], sizes = [8, 32], strides = [1, 1]} : vector<8x128xf32> to vector<8x32xf32>
    %217 = vector.extract_strided_slice %205 {offsets = [0, 96], sizes = [8, 32], strides = [1, 1]} : vector<8x128xf32> to vector<8x32xf32>
    %cst_84 = arith.constant 1.000000e+00 : f32
    %218 = vector.broadcast %cst_84 : f32 to vector<8x32xf32>
    %219 = arith.addf %217, %218 : vector<8x32xf32>
    %cst_85 = arith.constant 5.000000e-01 : f32
    %220 = vector.broadcast %cst_85 : f32 to vector<8x32xf32>
    %221 = arith.mulf %220, %219 : vector<8x32xf32>
    %222 = arith.mulf %215, %194 : vector<8x32xf32>
    %223 = arith.mulf %210, %216 : vector<8x32xf32>
    %224 = arith.addf %222, %223 : vector<8x32xf32>
    %225 = math.tanh %224 : vector<8x32xf32>
    %226 = arith.mulf %221, %225 : vector<8x32xf32>
    %227 = arith.index_cast %200 : i32 to index
    %c0_86 = arith.constant 0 : index
    %228 = vector.load %arg14[%227, %c0_86] : memref<64x32xf32, #tpu.memory_space<vmem>>, vector<8x32xf32>
    tpu.vector_store %arg14[%227, %c0_86], %226 {strides = array<i32>} : memref<64x32xf32, #tpu.memory_space<vmem>>, vector<8x32xf32>,
    %c7_i32 = arith.constant 7 : i32
    %c8_i32_87 = arith.constant 8 : i32
    %229 = arith.muli %c7_i32, %c8_i32_87 : i32
    %230 = tpu.assume_multiple %229, 8 : i32
    %231 = arith.index_cast %230 : i32 to index
    %c0_88 = arith.constant 0 : index
    %232 = vector.load %arg13[%231, %c0_88] : memref<64x128xf32, #tpu.memory_space<vmem>>, vector<8x128xf32>
    %cst_89 = arith.constant dense<0.000000e+00> : vector<8x128xf32>
    %233 = tpu.matmul %226, %18, %cst_89 {dimension_numbers = #tpu.dot_dimension_numbers<[1], [0], [0], [1], [0, 0, 1, 1], [], []>} : vector<8x32xf32>, vector<32x128xf32>, vector<8x128xf32> -> vector<8x128xf32>
    %234 = arith.addf %232, %233 : vector<8x128xf32>
    %235 = math.tanh %234 : vector<8x128xf32>
    %236 = vector.extract_strided_slice %235 {offsets = [0, 0], sizes = [8, 32], strides = [1, 1]} : vector<8x128xf32> to vector<8x32xf32>
    %cst_90 = arith.constant 1.000000e+00 : f32
    %237 = vector.broadcast %cst_90 : f32 to vector<8x32xf32>
    %238 = arith.addf %236, %237 : vector<8x32xf32>
    %cst_91 = arith.constant 5.000000e-01 : f32
    %239 = vector.broadcast %cst_91 : f32 to vector<8x32xf32>
    %240 = arith.mulf %239, %238 : vector<8x32xf32>
    %241 = vector.extract_strided_slice %235 {offsets = [0, 32], sizes = [8, 32], strides = [1, 1]} : vector<8x128xf32> to vector<8x32xf32>
    %cst_92 = arith.constant 1.000000e+00 : f32
    %242 = vector.broadcast %cst_92 : f32 to vector<8x32xf32>
    %243 = arith.addf %241, %242 : vector<8x32xf32>
    %cst_93 = arith.constant 5.000000e-01 : f32
    %244 = vector.broadcast %cst_93 : f32 to vector<8x32xf32>
    %245 = arith.mulf %244, %243 : vector<8x32xf32>
    %246 = vector.extract_strided_slice %235 {offsets = [0, 64], sizes = [8, 32], strides = [1, 1]} : vector<8x128xf32> to vector<8x32xf32>
    %247 = vector.extract_strided_slice %235 {offsets = [0, 96], sizes = [8, 32], strides = [1, 1]} : vector<8x128xf32> to vector<8x32xf32>
    %cst_94 = arith.constant 1.000000e+00 : f32
    %248 = vector.broadcast %cst_94 : f32 to vector<8x32xf32>
    %249 = arith.addf %247, %248 : vector<8x32xf32>
    %cst_95 = arith.constant 5.000000e-01 : f32
    %250 = vector.broadcast %cst_95 : f32 to vector<8x32xf32>
    %251 = arith.mulf %250, %249 : vector<8x32xf32>
    %252 = arith.mulf %245, %224 : vector<8x32xf32>
    %253 = arith.mulf %240, %246 : vector<8x32xf32>
    %254 = arith.addf %252, %253 : vector<8x32xf32>
    %255 = math.tanh %254 : vector<8x32xf32>
    %256 = arith.mulf %251, %255 : vector<8x32xf32>
    %257 = arith.index_cast %230 : i32 to index
    %c0_96 = arith.constant 0 : index
    %258 = vector.load %arg14[%257, %c0_96] : memref<64x32xf32, #tpu.memory_space<vmem>>, vector<8x32xf32>
    tpu.vector_store %arg14[%257, %c0_96], %256 {strides = array<i32>} : memref<64x32xf32, #tpu.memory_space<vmem>>, vector<8x32xf32>,
    %c8_i32_97 = arith.constant 8 : i32
    %c0_98 = arith.constant 0 : index
    %c0_99 = arith.constant 0 : index
    %c0_100 = arith.constant 0 : index
    %259 = vector.load %arg11[%c0_98, %c0_99, %c0_100] : memref<1x8x32xf32, #tpu.memory_space<vmem>>, vector<1x8x32xf32>
    %260 = vector.shape_cast %259 : vector<1x8x32xf32> to vector<8x32xf32>
    %261 = vector.shape_cast %256 : vector<8x32xf32> to vector<1x8x32xf32>
    tpu.vector_store %arg11[%c0_98, %c0_99, %c0_100], %261 {strides = array<i32>} : memref<1x8x32xf32, #tpu.memory_space<vmem>>, vector<1x8x32xf32>,
    %c0_101 = arith.constant 0 : index
    %c0_102 = arith.constant 0 : index
    %c0_103 = arith.constant 0 : index
    %262 = vector.load %arg12[%c0_101, %c0_102, %c0_103] : memref<1x8x32xf32, #tpu.memory_space<vmem>>, vector<1x8x32xf32>
    %263 = vector.shape_cast %262 : vector<1x8x32xf32> to vector<8x32xf32>
    %264 = vector.shape_cast %254 : vector<8x32xf32> to vector<1x8x32xf32>
    tpu.vector_store %arg12[%c0_101, %c0_102, %c0_103], %264 {strides = array<i32>} : memref<1x8x32xf32, #tpu.memory_space<vmem>>, vector<1x8x32xf32>,
    %c0_104 = arith.constant 0 : index
    %c0_105 = arith.constant 0 : index
    %265 = vector.load %arg14[%c0_104, %c0_105] : memref<64x32xf32, #tpu.memory_space<vmem>>, vector<64x32xf32>
    %c0_106 = arith.constant 0 : index
    %c0_107 = arith.constant 0 : index
    %266 = vector.load %arg8[%c0_106, %c0_107] : memref<32x128xf32, #tpu.memory_space<vmem>>, vector<32x128xf32>
    %cst_108 = arith.constant dense<0.000000e+00> : vector<64x128xf32>
    %267 = tpu.matmul %265, %266, %cst_108 {dimension_numbers = #tpu.dot_dimension_numbers<[1], [0], [0], [1], [0, 0, 1, 1], [], []>} : vector<64x32xf32>, vector<32x128xf32>, vector<64x128xf32> -> vector<64x128xf32>
    %c0_109 = arith.constant 0 : index
    %c0_110 = arith.constant 0 : index
    %268 = vector.load %arg9[%c0_109, %c0_110] : memref<1x128xf32, #tpu.memory_space<vmem>>, vector<1x128xf32>
    %269 = vector.broadcast %268 : vector<1x128xf32> to vector<64x128xf32>
    %270 = arith.addf %267, %269 : vector<64x128xf32>
    %271 = tpu.iota {dimensions = array<i32: 1>} : vector<64x128xi32>
    %c4_i32_111 = arith.constant 4 : i32
    %272 = vector.broadcast %c4_i32_111 : i32 to vector<64x128xi32>
    %273 = arith.cmpi slt, %271, %272 : vector<64x128xi32>
    %c12_i32 = arith.constant 12 : i32
    %274 = vector.broadcast %c12_i32 : i32 to vector<64x128xi32>
    %275 = arith.cmpi sge, %271, %274 : vector<64x128xi32>
    %c20_i32 = arith.constant 20 : i32
    %276 = vector.broadcast %c20_i32 : i32 to vector<64x128xi32>
    %277 = arith.cmpi slt, %271, %276 : vector<64x128xi32>
    %278 = arith.andi %275, %277 : vector<64x128xi1>
    %c20_i32_112 = arith.constant 20 : i32
    %279 = vector.broadcast %c20_i32_112 : i32 to vector<64x128xi32>
    %280 = arith.cmpi sge, %271, %279 : vector<64x128xi32>
    %c24_i32 = arith.constant 24 : i32
    %281 = vector.broadcast %c24_i32 : i32 to vector<64x128xi32>
    %282 = arith.cmpi slt, %271, %281 : vector<64x128xi32>
    %283 = arith.andi %280, %282 : vector<64x128xi1>
    %c24_i32_113 = arith.constant 24 : i32
    %284 = vector.broadcast %c24_i32_113 : i32 to vector<64x128xi32>
    %285 = arith.cmpi sge, %271, %284 : vector<64x128xi32>
    %c27_i32 = arith.constant 27 : i32
    %286 = vector.broadcast %c27_i32 : i32 to vector<64x128xi32>
    %287 = arith.cmpi slt, %271, %286 : vector<64x128xi32>
    %288 = arith.andi %285, %287 : vector<64x128xi1>
    %cst_114 = arith.constant -1.000000e+30 : f32
    %289 = vector.broadcast %cst_114 : f32 to vector<64x128xf32>
    %290 = arith.select %273, %270, %289 : vector<64x128xi1>, vector<64x128xf32>
    %cst_115 = arith.constant dense<0xFF800000> : vector<64xf32>
    %291 = vector.multi_reduction <maximumf>, %290, %cst_115 [1] : vector<64x128xf32> to vector<64xf32>
    %292 = vector.shape_cast %291 : vector<64xf32> to vector<64x1xf32>
    %cst_116 = arith.constant -1.000000e+30 : f32
    %293 = vector.broadcast %cst_116 : f32 to vector<64x128xf32>
    %294 = arith.select %288, %270, %293 : vector<64x128xi1>, vector<64x128xf32>
    %cst_117 = arith.constant dense<0xFF800000> : vector<64xf32>
    %295 = vector.multi_reduction <maximumf>, %294, %cst_117 [1] : vector<64x128xf32> to vector<64xf32>
    %296 = vector.shape_cast %295 : vector<64xf32> to vector<64x1xf32>
    %cst_118 = arith.constant 0.000000e+00 : f32
    %297 = vector.broadcast %cst_118 : f32 to vector<64x128xf32>
    %298 = arith.select %278, %297, %270 : vector<64x128xi1>, vector<64x128xf32>
    %299 = vector.shape_cast %296 : vector<64x1xf32> to vector<64x1xf32>
    %300 = vector.broadcast %299 : vector<64x1xf32> to vector<64x128xf32>
    %301 = arith.select %288, %300, %298 : vector<64x128xi1>, vector<64x128xf32>
    %302 = vector.shape_cast %292 : vector<64x1xf32> to vector<64x1xf32>
    %303 = vector.broadcast %302 : vector<64x1xf32> to vector<64x128xf32>
    %304 = arith.select %273, %303, %301 : vector<64x128xi1>, vector<64x128xf32>
    %305 = arith.subf %270, %304 : vector<64x128xf32>
    %306 = math.exp %305 : vector<64x128xf32>
    %cst_119 = arith.constant 0.000000e+00 : f32
    %307 = vector.broadcast %cst_119 : f32 to vector<64x128xf32>
    %308 = arith.select %273, %306, %307 : vector<64x128xi1>, vector<64x128xf32>
    %cst_120 = arith.constant dense<0.000000e+00> : vector<64xf32>
    %309 = vector.multi_reduction <add>, %308, %cst_120 [1] : vector<64x128xf32> to vector<64xf32>
    %310 = vector.shape_cast %309 : vector<64xf32> to vector<64x1xf32>
    %cst_121 = arith.constant 0.000000e+00 : f32
    %311 = vector.broadcast %cst_121 : f32 to vector<64x128xf32>
    %312 = arith.select %288, %306, %311 : vector<64x128xi1>, vector<64x128xf32>
    %cst_122 = arith.constant dense<0.000000e+00> : vector<64xf32>
    %313 = vector.multi_reduction <add>, %312, %cst_122 [1] : vector<64x128xf32> to vector<64xf32>
    %314 = vector.shape_cast %313 : vector<64xf32> to vector<64x1xf32>
    %315 = vector.broadcast %310 : vector<64x1xf32> to vector<64x128xf32>
    %316 = arith.divf %306, %315 : vector<64x128xf32>
    %317 = vector.broadcast %314 : vector<64x1xf32> to vector<64x128xf32>
    %318 = arith.divf %306, %317 : vector<64x128xf32>
    %319 = math.tanh %270 : vector<64x128xf32>
    %320 = arith.select %283, %319, %270 : vector<64x128xi1>, vector<64x128xf32>
    %321 = arith.select %278, %306, %320 : vector<64x128xi1>, vector<64x128xf32>
    %322 = arith.select %288, %318, %321 : vector<64x128xi1>, vector<64x128xf32>
    %323 = arith.select %273, %316, %322 : vector<64x128xi1>, vector<64x128xf32>
    %c0_123 = arith.constant 0 : index
    %c0_124 = arith.constant 0 : index
    %c0_125 = arith.constant 0 : index
    %324 = vector.load %arg10[%c0_123, %c0_124, %c0_125] : memref<1x64x128xf32, #tpu.memory_space<vmem>>, vector<1x64x128xf32>
    %325 = vector.shape_cast %324 : vector<1x64x128xf32> to vector<64x128xf32>
    %326 = vector.shape_cast %323 : vector<64x128xf32> to vector<1x64x128xf32>
    tpu.vector_store %arg10[%c0_123, %c0_124, %c0_125], %326 {strides = array<i32>} : memref<1x64x128xf32, #tpu.memory_space<vmem>>, vector<1x64x128xf32>,
    return
  }
  func.func @transform_0(%arg0: i32) -> (i32, i32, i32) {
    %c0_i32 = arith.constant 0 : i32
    %c0_i32_0 = arith.constant 0 : i32
    %c0_i32_1 = arith.constant 0 : i32
    return %arg0, %c0_i32, %c0_i32_0 : i32, i32, i32
  }
  func.func @transform_1(%arg0: i32) -> (i32, i32, i32) {
    %c0_i32 = arith.constant 0 : i32
    %c0_i32_0 = arith.constant 0 : i32
    %c0_i32_1 = arith.constant 0 : i32
    return %arg0, %c0_i32, %c0_i32_0 : i32, i32, i32
  }
  func.func @transform_2(%arg0: i32) -> (i32, i32) {
    %c0_i32 = arith.constant 0 : i32
    %c0_i32_0 = arith.constant 0 : i32
    %c0_i32_1 = arith.constant 0 : i32
    return %c0_i32, %c0_i32_0 : i32, i32
  }
  func.func @transform_3(%arg0: i32) -> (i32, i32) {
    %c0_i32 = arith.constant 0 : i32
    %c0_i32_0 = arith.constant 0 : i32
    %c0_i32_1 = arith.constant 0 : i32
    return %c0_i32, %c0_i32_0 : i32, i32
  }
  func.func @transform_4(%arg0: i32) -> (i32, i32) {
    %c0_i32 = arith.constant 0 : i32
    %c0_i32_0 = arith.constant 0 : i32
    %c0_i32_1 = arith.constant 0 : i32
    return %c0_i32, %c0_i32_0 : i32, i32
  }
  func.func @transform_5(%arg0: i32) -> (i32, i32) {
    %c0_i32 = arith.constant 0 : i32
    %c0_i32_0 = arith.constant 0 : i32
    %c0_i32_1 = arith.constant 0 : i32
    return %c0_i32, %c0_i32_0 : i32, i32
  }
  func.func @transform_6(%arg0: i32) -> (i32, i32) {
    %c0_i32 = arith.constant 0 : i32
    %c0_i32_0 = arith.constant 0 : i32
    %c0_i32_1 = arith.constant 0 : i32
    return %c0_i32, %c0_i32_0 : i32, i32
  }
  func.func @transform_7(%arg0: i32) -> (i32, i32) {
    %c0_i32 = arith.constant 0 : i32
    %c0_i32_0 = arith.constant 0 : i32
    %c0_i32_1 = arith.constant 0 : i32
    return %c0_i32, %c0_i32_0 : i32, i32
  }
  func.func @transform_8(%arg0: i32) -> (i32, i32) {
    %c0_i32 = arith.constant 0 : i32
    %c0_i32_0 = arith.constant 0 : i32
    %c0_i32_1 = arith.constant 0 : i32
    return %c0_i32, %c0_i32_0 : i32, i32
  }
  func.func @transform_9(%arg0: i32) -> (i32, i32, i32) {
    %c0_i32 = arith.constant 0 : i32
    %c0_i32_0 = arith.constant 0 : i32
    %c0_i32_1 = arith.constant 0 : i32
    return %arg0, %c0_i32, %c0_i32_0 : i32, i32, i32
  }
  func.func @transform_10(%arg0: i32) -> (i32, i32, i32) {
    %c0_i32 = arith.constant 0 : i32
    %c0_i32_0 = arith.constant 0 : i32
    %c0_i32_1 = arith.constant 0 : i32
    return %arg0, %c0_i32, %c0_i32_0 : i32, i32, i32
  }
  func.func @transform_11(%arg0: i32) -> (i32, i32, i32) {
    %c0_i32 = arith.constant 0 : i32
    %c0_i32_0 = arith.constant 0 : i32
    %c0_i32_1 = arith.constant 0 : i32
    return %arg0, %c0_i32, %c0_i32_0 : i32, i32, i32
  }
}

</mosaic_0001>

<bundles_post_ra>
// kernel: decoder_forward.1
= control target key start
LH: loop header
LB: loop body
LE: loop exit
PB: predicated region body
PF: predicated region fallthrough
CT: control target
= control target key end

     0   :  { %17 = vsyncpa [#allocation5], 0  ;;  %s1871_s17 = smov [#allocation4]   ;;  %s2561_s0 = inlined_call_operand.vmem [shape: f32[1,64,32], index: 0, kind: input, shape index: {}]   ;;  %s2562_s1 = inlined_call_operand.vmem [shape: f32[1,8,16], index: 1, kind: input, shape index: {}]   ;;  %s2563_s2 = inlined_call_operand.hbm [shape: f32[16,64], index: 2, kind: input, shape index: {}]   ;;  %s2564_s3 = inlined_call_operand.vmem [shape: f32[1,64], index: 3, kind: input, shape index: {}]   ;;  %s2565_s4 = inlined_call_operand.vmem [shape: f32[32,128], index: 4, kind: input, shape index: {}]   ;;  %s2566_s5 = inlined_call_operand.vmem [shape: f32[1,128], index: 5, kind: input, shape index: {}]   ;;  %s2567_s6 = inlined_call_operand.vmem [shape: f32[32,128], index: 6, kind: input, shape index: {}]   ;;  %s2568_s7 = inlined_call_operand.vmem [shape: f32[32,128], index: 7, kind: input, shape index: {}]   ;;  %s2569_s8 = inlined_call_operand.vmem [shape: f32[1,128], index: 8, kind: input, shape index: {}]   ;;  %s2570_s9 = inlined_call_operand.vmem [shape: f32[1,64,128], index: 9, kind: output, shape index: {0}]   ;;  %s2571_s10 = inlined_call_operand.vmem [shape: f32[1,8,32], index: 10, kind: output, shape index: {1}]   ;;  %s2572_s11 = inlined_call_operand.vmem [shape: f32[1,8,32], index: 11, kind: output, shape index: {2}]  }
   0x1   :  { %s27_s18 = sshll.u32 %s1871_s17, 4  ;;  %s28_s18 = int_to_ptr.vmem [resolvable:$true] %s27_s18 }
   0x2   :  { %s1857_s19 = scalar_lea.vmem %s28_s18, 256  ;;  %p1862_p1 = scmp.lt.s32.totalorder %s28_s18, %s28_s18 }
   0x3   :  { %p1858_p0 = scmp.ne.s32.totalorder %s28_s18, %s1857_s19  ;;  %p1863_p2 = scmp.lt.s32.totalorder %s1857_s19, %s1857_s19 }
   0x5   :  { %p1864_p3 = por %p1863_p2, %p1862_p1 }
   0x7   :  { %p1865_p4 = pnand %p1864_p3, %p1858_p0 }
   0x9   :  { %1868 = shalt.err (!%p1865_p4)
}
   0xa   :  { %s1872_s20 = smov 128   ;;  %s1873_s21 = smov 8  }
   0xb   :  { %33 = dma.hbm_to_vmem [thread:$0]  %s2563_s2, 256, %s28_s18, [#allocation5], %s1872_s20, %s1872_s20, %s1873_s21  }
   0xc   :  { %1869 = dma.done.wait [#allocation5], 256  }
   0xd   :  { %1870 = vsyncadd [#allocation5], 4294967040  ;;  %v1874_v0 = vmov 0.0   ;;  %vm1875_vm0 = vmmov 0   ;;  %v51_v1 = vld [vmem:[#allocation4 + $0x8] sm:$0xff]  ;;  %v50_v2 = vld [vmem:[#allocation4] sm:$0xff] }
   0xe   :  { %1600 = vmatprep.subr.mxu0 %v1874_v0  ;;  %1604 = vmatprep.mubr.msk.f32.mxu0 %vm1875_vm0, %v1874_v0  ;;  %v49_v3 = vld [vmem:[%s2562_s1] sm:$0xff]  ;;  %vm59_vm1 = vcmask 130048   ;;  %v145_v4 = vld [vmem:[%s2565_s4 + $0x18] sm:$0xff]  ;;  %v144_v5 = vld [vmem:[%s2565_s4 + $0x10] sm:$0xff]  ;;  %vm153_vm2 = vcmask 261120   ;;  %s1876_s1 = smov 64  }
   0xf   :  { %1601 = vmatpush3.msra.mxu0 %v51_v1  ;;  %1735 = vmatprep.subr.mxu1 %v145_v4  ;;  %v143_v6 = vld [vmem:[%s2565_s4 + $0x8] sm:$0xff]  ;;  %v142_v7 = vld [vmem:[%s2565_s4] sm:$0xff]  ;;  %v1971_v10 = vld [vmem:[%s2567_s6 + $0x18] sm:$0xff]  ;;  %s1877_s29 = smov 32   ;;  %s1878_s13 = smov 96  }
  0x10   :  { %1602 = vmatprep.subr.mxu0 %v1874_v0  ;;  %1739 = vmatpush3.msra.mxu1 %v145_v4  ;;  %v134_v8 = vld [vmem:[%s2561_s0] sm:$0xff]  ;;  %v135_v9 = vld [vmem:[%s2561_s0 + $0x8] sm:$0xff]  ;;  %v136_v11 = vld [vmem:[%s2561_s0 + $0x10] sm:$0xff] }
  0x11   :  { %1603 = vmatpush3.msra.mxu0 %v50_v2  ;;  %1736 = vmatprep.subr.mxu1 %v144_v5  ;;  %v1981_v12 = vld [vmem:[%s2567_s6 + $0x10] sm:$0xff]  ;;  %v137_v13 = vld [vmem:[%s2561_s0 + $0x18] sm:$0xff]  ;;  %v1992_v14 = vld [vmem:[%s2567_s6 + $0x8] sm:$0xff] }
  0x12   :  { %1605 = vmatmul.mubr.msk.f32.vlgmr.msra.gmra.mxu0 %vm59_vm1, %v49_v3  ;;  %1607 = vmatprep.subr.mxu0 %v145_v4  ;;  %v2001_v15 = vld [vmem:[%s2567_s6] sm:$0xff]  ;;  %v139_v55 = vld [vmem:[%s2561_s0 + $0x28] sm:$0xff]  ;;  %v140_v56 = vld [vmem:[%s2561_s0 + $0x30] sm:$0xff] }
  0x13   :  { %1608 = vmatpush3.msra.mxu0 %v145_v4  ;;  %1740 = vmatpush3.msra.mxu1 %v144_v5  ;;  %v1505_v16 = vld [vmem:[%s2564_s3] ss:$0 sm:$0xff]  ;;  %v141_v57 = vld [vmem:[%s2561_s0 + $0x38] sm:$0xff] }
  0x14   :  { %1609 = vmatprep.subr.mxu0 %v144_v5  ;;  %1737 = vmatprep.subr.mxu1 %v143_v6  ;;  %v2028_v24 = vld [vmem:[%s2566_s5] ss:$0 sm:$0xff] }
  0x15   :  { %1610 = vmatpush3.msra.mxu0 %v144_v5  ;;  %1615 = vmatprep.mubr.msk.f32.mxu0 %vm153_vm2, %v134_v8  ;;  %v138_v54 = vld [vmem:[%s2561_s0 + $0x20] sm:$0xff] }
  0x16   :  { %1611 = vmatprep.subr.mxu0 %v143_v6  ;;  %1741 = vmatpush3.msra.mxu1 %v143_v6 }
  0x17   :  { %1612 = vmatpush3.msra.mxu0 %v143_v6  ;;  %1738 = vmatprep.subr.mxu1 %v142_v7 }
  0x18   :  { %1613 = vmatprep.subr.mxu0 %v142_v7  ;;  %1742 = vmatpush3.msra.mxu1 %v142_v7 }
  0x19   :  { %1614 = vmatpush3.msra.mxu0 %v142_v7  ;;  %1649 = vmatprep.subr.mxu1 %v1874_v0 }
  0x1a   :  { %1616 = vmatmul.mubr.msk.f32.vlgmr.msra.gmra.mxu0 %vm153_vm2, %v135_v9  ;;  %1627 = vmatprep.subr.mxu0 %v1874_v0 }
  0x1b   :  { %1628 = vmatpush3.msra.mxu0 %v1971_v10  ;;  %1618 = vmatprep.mubr.msk.f32.mxu0 %vm153_vm2, %v136_v11 }
  0x1c   :  { %1629 = vmatprep.subr.mxu0 %v1874_v0  ;;  %1621 = vmatprep.mubr.msk.f32.mxu1 %vm153_vm2, %v138_v54 }
  0x1d   :  { %1630 = vmatpush3.msra.mxu0 %v1981_v12  ;;  %1622 = vmatmul.mubr.msk.f32.vlgmr.msra.gmra.mxu1 %vm153_vm2, %v139_v55 }
  0x1e   :  { %1619 = vmatmul.mubr.msk.f32.gmra.mxu0 %vm153_vm2, %v137_v13  ;;  %1631 = vmatprep.subr.mxu0 %v1874_v0 }
  0x1f   :  { %1632 = vmatpush3.msra.mxu0 %v1992_v14  ;;  %1635 = vmatprep.mubr.msk.f32.mxu0 %vm1875_vm0, %v1874_v0 }
  0x20   :  { %1633 = vmatprep.subr.mxu0 %v1874_v0  ;;  %1650 = vmatpush3.msra.mxu1 %v1971_v10 }
  0x21   :  { %1634 = vmatpush3.msra.mxu0 %v2001_v15  ;;  %1624 = vmatprep.mubr.msk.f32.mxu1 %vm153_vm2, %v140_v56 }
  0x22   :  { %1638 = vmatprep.subr.mxu0 %v1874_v0  ;;  %1651 = vmatprep.subr.mxu1 %v1874_v0 }
  0x23   :  { %1652 = vmatpush3.msra.mxu1 %v1981_v12 }
  0x24   :  { %1625 = vmatmul.mubr.msk.f32.gmra.mxu1 %vm153_vm2, %v141_v57  ;;  %1653 = vmatprep.subr.mxu1 %v1874_v0 }
  0x25   :  { %1654 = vmatpush3.msra.mxu1 %v1992_v14  ;;  %1657 = vmatprep.mubr.msk.f32.mxu1 %vm1875_vm0, %v1874_v0 }
  0x26   :  { %1655 = vmatprep.subr.mxu1 %v1874_v0 }
  0x27   :  { %1656 = vmatpush3.msra.mxu1 %v2001_v15 }
  0x28   :  { %1671 = vmatprep.subr.mxu1 %v1874_v0 }
  0xd2   :  { %v129_v17 = vpop.f32.mrf.mxu0 }
  0xd3   :  { %v130_v18 = vadd.f32 %v1505_v16, %v129_v17 }
  0xd4   :  { %v1606_v19 = vpop.f32.mrf.mxu0 }
  0xd5   :  { %1751 = vtanh.f32 %v130_v18 }
  0xda   :  { %v1617_v21 = vpop.f32.mrf.mxu0 }
  0xdb   :  { %v250_v42 = vadd.f32 %v1617_v21, %v2028_v24 }
  0xdc   :  { %v244_v22 = vpop.f32.mrf.mxu0 }
  0xdd   :  { %v245_v26 = vadd.f32 %v2028_v24, %v244_v22  ;;  %v2092_v62 = vpop.f32.mrf.mxu1 }
  0xde   :  { %v2023_v23 = vpop.f32.mrf.mxu0  ;;  %v270_v56 = vadd.f32 %v2092_v62, %v2028_v24 }
  0xdf   :  { %v2094_v63 = vpop.f32.mrf.mxu1 }
  0xe0   :  { %v2030_v25 = vpop.f32.mrf.mxu0 }
  0xe1   :  { %v255_v3 = vadd.f32 %v2028_v24, %v2030_v25  ;;  %v260_v25 = vadd.f32 %v2023_v23, %v2028_v24 }
  0xe2   :  { %v1752_v20 = vpop.eup %1751 }
  0xe3   :  { %1636 = vmatmul.mubr.msk.f32.vlgmr.msra.gmra.mxu0 %vm153_vm2, %v1752_v20 }
  0xe4   :  { %1639 = vmatpush3.msra.mxu0 %v1971_v10  ;;  %1646 = vmatprep.mubr.msk.f32.mxu0 %vm1875_vm0, %v1874_v0  ;;  %v2096_v1 = vpop.f32.mrf.mxu1 }
  0xe5   :  { %1640 = vmatprep.subr.mxu0 %v1874_v0 }
  0xe6   :  { %1641 = vmatpush3.msra.mxu0 %v1981_v12  ;;  %v2098_v2 = vpop.f32.mrf.mxu1 }
  0xe7   :  { %1642 = vmatprep.subr.mxu0 %v1874_v0 }
  0xe8   :  { %1643 = vmatpush3.msra.mxu0 %v1992_v14 }
  0xe9   :  { %1644 = vmatprep.subr.mxu0 %v1874_v0 }
  0xea   :  { %1645 = vmatpush3.msra.mxu0 %v2001_v15 }
  0xeb   :  { %1660 = vmatprep.subr.mxu0 %v1874_v0 }
 0x1a3   :  { %v365_v27 = vpop.f32.mrf.mxu0 }
 0x1a4   :  { %v369_v28 = vadd.f32 %v365_v27, %v245_v26 }
 0x1a5   :  { %v1637_v29 = vpop.f32.mrf.mxu0 }
 0x1a6   :  { %1753 = vtanh.f32 %v369_v28 }
 0x1b3   :  { %v1754_v30 = vpop.eup %1753 }
 0x1b4   :  { %375 = vrot.lane.b32.xlu0 %v1754_v30, %s1876_s1  ;;  %v371_v31 = vadd.f32 1.0, %v1754_v30 }
 0x1b6   :  { %v372_v32 = vmul.f32 0.5, %v371_v31 }
 0x1b8   :  { %v373_v35 = vmul.f32 %v1752_v20, %v372_v32 }
 0x226   :  { %v376_v33 = vpop.permute.xlu0 %375 }
 0x227   :  { %v378_v34 = vmul.f32 %v376_v33, %v372_v32 }
 0x229   :  { %380 = vrot.lane.b32.xlu0 %v378_v34, %s1877_s29 }
 0x29b   :  { %v381_v36 = vpop.permute.xlu0 %380 }
 0x29c   :  { %v383_v37 = vadd.f32 %v381_v36, %v373_v35 }
 0x29e   :  { %1755 = vtanh.f32 %v383_v37 }
 0x2ab   :  { %v1756_v38 = vpop.eup %1755 }
 0x2ac   :  { %386 = vrot.lane.b32.xlu1 %v1756_v38, %s1876_s1 }
 0x31e   :  { %v387_v39 = vpop.permute.xlu1 %386 }
 0x31f   :  { %v389_v40 = vmul.f32 %v387_v39, %v372_v32 }
 0x321   :  { %391 = vrot.lane.b32.xlu1 %v389_v40, %s1877_s29  ;;  %v265_v40 = vadd.f32 %v2028_v24, %v2094_v63 }
 0x393   :  { %v392_v41 = vpop.permute.xlu1 %391 }
 0x394   :  { %394 = vst.msk [vmem:[#allocation3] sm:$0xff] %vm153_vm2, %v392_v41  ;;  %1647 = vmatmul.mubr.msk.f32.vlgmr.msra.gmra.mxu0 %vm153_vm2, %v392_v41 }
 0x395   :  { %1661 = vmatpush3.msra.mxu0 %v1971_v10  ;;  %1668 = vmatprep.mubr.msk.f32.mxu0 %vm1875_vm0, %v1874_v0 }
 0x396   :  { %1662 = vmatprep.subr.mxu0 %v1874_v0 }
 0x397   :  { %1663 = vmatpush3.msra.mxu0 %v1981_v12 }
 0x398   :  { %1664 = vmatprep.subr.mxu0 %v1874_v0 }
 0x399   :  { %1665 = vmatpush3.msra.mxu0 %v1992_v14 }
 0x39a   :  { %1666 = vmatprep.subr.mxu0 %v1874_v0 }
 0x39b   :  { %1667 = vmatpush3.msra.mxu0 %v2001_v15 }
 0x39c   :  { %1682 = vmatprep.subr.mxu0 %v1874_v0 }
 0x454   :  { %v465_v43 = vpop.f32.mrf.mxu0 }
 0x455   :  { %v469_v44 = vadd.f32 %v465_v43, %v250_v42 }
 0x456   :  { %v1648_v45 = vpop.f32.mrf.mxu0 }
 0x457   :  { %1757 = vtanh.f32 %v469_v44 }
 0x464   :  { %v1758_v46 = vpop.eup %1757 }
 0x465   :  { %475 = vrot.lane.b32.xlu0 %v1758_v46, %s1876_s1  ;;  %v471_v47 = vadd.f32 1.0, %v1758_v46 }
 0x467   :  { %v472_v48 = vmul.f32 0.5, %v471_v47 }
 0x469   :  { %v473_v51 = vmul.f32 %v472_v48, %v383_v37 }
 0x4d7   :  { %v476_v49 = vpop.permute.xlu0 %475 }
 0x4d8   :  { %v478_v50 = vmul.f32 %v476_v49, %v472_v48 }
 0x4da   :  { %480 = vrot.lane.b32.xlu1 %v478_v50, %s1877_s29 }
 0x54c   :  { %v481_v52 = vpop.permute.xlu1 %480 }
 0x54d   :  { %v483_v53 = vadd.f32 %v481_v52, %v473_v51 }
 0x54f   :  { %1759 = vtanh.f32 %v483_v53 }
 0x55c   :  { %v1760_v58 = vpop.eup %1759 }
 0x55d   :  { %486 = vrot.lane.b32.xlu0 %v1760_v58, %s1876_s1 }
 0x5cf   :  { %v487_v59 = vpop.permute.xlu0 %486 }
 0x5d0   :  { %v489_v60 = vmul.f32 %v487_v59, %v472_v48 }
 0x5d2   :  { %491 = vrot.lane.b32.xlu1 %v489_v60, %s1877_s29 }
 0x644   :  { %v492_v61 = vpop.permute.xlu1 %491 }
 0x645   :  { %495 = vst.msk [vmem:[#allocation3 + $0x8] sm:$0xff] %vm153_vm2, %v492_v61  ;;  %1658 = vmatmul.mubr.msk.f32.vlgmr.msra.gmra.mxu1 %vm153_vm2, %v492_v61 }
 0x646   :  { %1672 = vmatpush3.msra.mxu1 %v1971_v10  ;;  %1679 = vmatprep.mubr.msk.f32.mxu1 %vm1875_vm0, %v1874_v0 }
 0x647   :  { %1673 = vmatprep.subr.mxu1 %v1874_v0 }
 0x648   :  { %1674 = vmatpush3.msra.mxu1 %v1981_v12 }
 0x649   :  { %1675 = vmatprep.subr.mxu1 %v1874_v0 }
 0x64a   :  { %1676 = vmatpush3.msra.mxu1 %v1992_v14 }
 0x64b   :  { %1677 = vmatprep.subr.mxu1 %v1874_v0 }
 0x64c   :  { %1678 = vmatpush3.msra.mxu1 %v2001_v15 }
 0x64d   :  { %1693 = vmatprep.subr.mxu1 %v1874_v0 }
 0x705   :  { %v566_v4 = vpop.f32.mrf.mxu1 }
 0x706   :  { %v570_v5 = vadd.f32 %v566_v4, %v255_v3 }
 0x707   :  { %v1659_v6 = vpop.f32.mrf.mxu1 }
 0x708   :  { %1761 = vtanh.f32 %v570_v5 }
 0x715   :  { %v1762_v7 = vpop.eup %1761 }
 0x716   :  { %576 = vrot.lane.b32.xlu0 %v1762_v7, %s1876_s1  ;;  %v572_v8 = vadd.f32 1.0, %v1762_v7  ;;  %v1118_v7 = vld [vmem:[%s2568_s7 + $0x10] sm:$0xff] }
 0x718   :  { %v573_v9 = vmul.f32 0.5, %v572_v8  ;;  %v1108_v8 = vld [vmem:[#allocation3] sm:$0xff] }
 0x71a   :  { %v574_v16 = vmul.f32 %v573_v9, %v483_v53 }
 0x788   :  { %v577_v11 = vpop.permute.xlu0 %576 }
 0x789   :  { %v579_v13 = vmul.f32 %v577_v11, %v573_v9  ;;  %v1116_v11 = vld [vmem:[%s2568_s7] sm:$0xff] }
 0x78b   :  { %581 = vrot.lane.b32.xlu1 %v579_v13, %s1877_s29  ;;  %v1109_v13 = vld [vmem:[#allocation3 + $0x8] sm:$0xff] }
 0x7fd   :  { %v582_v17 = vpop.permute.xlu1 %581 }
 0x7fe   :  { %v584_v18 = vadd.f32 %v582_v17, %v574_v16 }
 0x800   :  { %1763 = vtanh.f32 %v584_v18 }
 0x80d   :  { %v1764_v19 = vpop.eup %1763 }
 0x80e   :  { %587 = vrot.lane.b32.xlu0 %v1764_v19, %s1876_s1 }
 0x880   :  { %v588_v20 = vpop.permute.xlu0 %587 }
 0x881   :  { %v590_v21 = vmul.f32 %v588_v20, %v573_v9  ;;  %v1117_v9 = vld [vmem:[%s2568_s7 + $0x8] sm:$0xff]  ;;  %v275_v20 = vadd.f32 %v2028_v24, %v2098_v2 }
 0x883   :  { %592 = vrot.lane.b32.xlu1 %v590_v21, %s1877_s29 }
 0x8f5   :  { %v593_v22 = vpop.permute.xlu1 %592 }
 0x8f6   :  { %596 = vst.msk [vmem:[#allocation3 + $0x10] sm:$0xff] %vm153_vm2, %v593_v22  ;;  %1669 = vmatmul.mubr.msk.f32.vlgmr.msra.gmra.mxu0 %vm153_vm2, %v593_v22 }
 0x8f7   :  { %1683 = vmatpush3.msra.mxu0 %v1971_v10  ;;  %1690 = vmatprep.mubr.msk.f32.mxu0 %vm1875_vm0, %v1874_v0 }
 0x8f8   :  { %1684 = vmatprep.subr.mxu0 %v1874_v0 }
 0x8f9   :  { %1685 = vmatpush3.msra.mxu0 %v1981_v12 }
 0x8fa   :  { %1686 = vmatprep.subr.mxu0 %v1874_v0 }
 0x8fb   :  { %1687 = vmatpush3.msra.mxu0 %v1992_v14 }
 0x8fc   :  { %1688 = vmatprep.subr.mxu0 %v1874_v0 }
 0x8fd   :  { %1689 = vmatpush3.msra.mxu0 %v2001_v15  ;;  %v1110_v16 = vld [vmem:[#allocation3 + $0x10] sm:$0xff] }
 0x8fe   :  { %1704 = vmatprep.subr.mxu0 %v1874_v0 }
 0x9b6   :  { %v667_v26 = vpop.f32.mrf.mxu0 }
 0x9b7   :  { %v671_v27 = vadd.f32 %v667_v26, %v260_v25 }
 0x9b8   :  { %v1670_v28 = vpop.f32.mrf.mxu0 }
 0x9b9   :  { %1765 = vtanh.f32 %v671_v27 }
 0x9c6   :  { %v1766_v29 = vpop.eup %1765 }
 0x9c7   :  { %677 = vrot.lane.b32.xlu0 %v1766_v29, %s1876_s1  ;;  %v673_v30 = vadd.f32 1.0, %v1766_v29 }
 0x9c9   :  { %v674_v31 = vmul.f32 0.5, %v673_v30 }
 0x9cb   :  { %v675_v34 = vmul.f32 %v674_v31, %v584_v18 }
 0xa39   :  { %v678_v32 = vpop.permute.xlu0 %677 }
 0xa3a   :  { %v680_v33 = vmul.f32 %v678_v32, %v674_v31 }
 0xa3c   :  { %682 = vrot.lane.b32.xlu1 %v680_v33, %s1877_s29 }
 0xaae   :  { %v683_v35 = vpop.permute.xlu1 %682 }
 0xaaf   :  { %v685_v36 = vadd.f32 %v683_v35, %v675_v34 }
 0xab1   :  { %1767 = vtanh.f32 %v685_v36 }
 0xabe   :  { %v1768_v37 = vpop.eup %1767 }
 0xabf   :  { %688 = vrot.lane.b32.xlu0 %v1768_v37, %s1876_s1 }
 0xb31   :  { %v689_v23 = vpop.permute.xlu0 %688 }
 0xb32   :  { %v691_v38 = vmul.f32 %v689_v23, %v674_v31  ;;  %v280_v23 = vadd.f32 %v2096_v1, %v2028_v24 }
 0xb34   :  { %693 = vrot.lane.b32.xlu1 %v691_v38, %s1877_s29 }
 0xba6   :  { %v694_v39 = vpop.permute.xlu1 %693 }
 0xba7   :  { %697 = vst.msk [vmem:[#allocation3 + $0x18] sm:$0xff] %vm153_vm2, %v694_v39  ;;  %1680 = vmatmul.mubr.msk.f32.vlgmr.msra.gmra.mxu1 %vm153_vm2, %v694_v39 }
 0xba8   :  { %1694 = vmatpush3.msra.mxu1 %v1971_v10  ;;  %1701 = vmatprep.mubr.msk.f32.mxu1 %vm1875_vm0, %v1874_v0 }
 0xba9   :  { %1695 = vmatprep.subr.mxu1 %v1874_v0 }
 0xbaa   :  { %1696 = vmatpush3.msra.mxu1 %v1981_v12 }
 0xbab   :  { %1697 = vmatprep.subr.mxu1 %v1874_v0 }
 0xbac   :  { %1698 = vmatpush3.msra.mxu1 %v1992_v14 }
 0xbad   :  { %1699 = vmatprep.subr.mxu1 %v1874_v0 }
 0xbae   :  { %1700 = vmatpush3.msra.mxu1 %v2001_v15  ;;  %v1111_v17 = vld [vmem:[#allocation3 + $0x18] sm:$0xff] }
 0xc67   :  { %v768_v41 = vpop.f32.mrf.mxu1 }
 0xc68   :  { %v772_v42 = vadd.f32 %v768_v41, %v265_v40 }
 0xc69   :  { %v1681_v43 = vpop.f32.mrf.mxu1 }
 0xc6a   :  { %1769 = vtanh.f32 %v772_v42 }
 0xc77   :  { %v1770_v44 = vpop.eup %1769 }
 0xc78   :  { %778 = vrot.lane.b32.xlu0 %v1770_v44, %s1876_s1  ;;  %v774_v45 = vadd.f32 1.0, %v1770_v44 }
 0xc7a   :  { %v775_v46 = vmul.f32 0.5, %v774_v45 }
 0xc7c   :  { %v776_v49 = vmul.f32 %v775_v46, %v685_v36 }
 0xcea   :  { %v779_v47 = vpop.permute.xlu0 %778 }
 0xceb   :  { %v781_v48 = vmul.f32 %v779_v47, %v775_v46 }
 0xced   :  { %783 = vrot.lane.b32.xlu1 %v781_v48, %s1877_s29 }
 0xd5f   :  { %v784_v50 = vpop.permute.xlu1 %783 }
 0xd60   :  { %v786_v51 = vadd.f32 %v784_v50, %v776_v49  ;;  %v1256_v49 = vlaneseq }
 0xd62   :  { %1771 = vtanh.f32 %v786_v51 }
 0xd6f   :  { %v1772_v52 = vpop.eup %1771 }
 0xd70   :  { %789 = vrot.lane.b32.xlu0 %v1772_v52, %s1876_s1 }
 0xde2   :  { %v790_v53 = vpop.permute.xlu0 %789 }
 0xde3   :  { %v792_v54 = vmul.f32 %v790_v53, %v775_v46  ;;  %v2200_v53 = vld [vmem:[%s2569_s8] ss:$0 sm:$0xff] }
 0xde5   :  { %794 = vrot.lane.b32.xlu1 %v792_v54, %s1877_s29 }
 0xe57   :  { %v795_v55 = vpop.permute.xlu1 %794 }
 0xe58   :  { %798 = vst.msk [vmem:[#allocation3 + $0x20] sm:$0xff] %vm153_vm2, %v795_v55  ;;  %1691 = vmatmul.mubr.msk.f32.vlgmr.msra.gmra.mxu0 %vm153_vm2, %v795_v55 }
 0xe59   :  { %1705 = vmatpush3.msra.mxu0 %v1971_v10  ;;  %1712 = vmatprep.mubr.msk.f32.mxu0 %vm1875_vm0, %v1874_v0 }
 0xe5a   :  { %1706 = vmatprep.subr.mxu0 %v1874_v0 }
 0xe5b   :  { %1707 = vmatpush3.msra.mxu0 %v1981_v12 }
 0xe5c   :  { %1708 = vmatprep.subr.mxu0 %v1874_v0 }
 0xe5d   :  { %1709 = vmatpush3.msra.mxu0 %v1992_v14 }
 0xe5e   :  { %1710 = vmatprep.subr.mxu0 %v1874_v0 }
 0xe5f   :  { %1711 = vmatpush3.msra.mxu0 %v2001_v15  ;;  %v1119_v15 = vld [vmem:[%s2568_s7 + $0x18] sm:$0xff]  ;;  %v1112_v18 = vld [vmem:[#allocation3 + $0x20] sm:$0xff] }
 0xe60   :  { %1715 = vmatprep.subr.mxu1 %v1119_v15 }
 0xf18   :  { %v869_v57 = vpop.f32.mrf.mxu0 }
 0xf19   :  { %v873_v10 = vadd.f32 %v869_v57, %v270_v56 }
 0xf1a   :  { %v1692_v58 = vpop.f32.mrf.mxu0 }
 0xf1b   :  { %1773 = vtanh.f32 %v873_v10 }
 0xf28   :  { %v1774_v59 = vpop.eup %1773 }
 0xf29   :  { %879 = vrot.lane.b32.xlu0 %v1774_v59, %s1876_s1  ;;  %v875_v60 = vadd.f32 1.0, %v1774_v59 }
 0xf2b   :  { %v876_v12 = vmul.f32 0.5, %v875_v60 }
 0xf2d   :  { %v877_v14 = vmul.f32 %v876_v12, %v786_v51  ;;  %v2195_v51 = vand.u32 127, %v1256_v49 }
 0xf2f   :  { %vm1265_vm3 = vcmp.ge.s32.totalorder %v2195_v51, 24  ;;  %vm1266_vm4 = vcmp.lt.s32.totalorder %v2195_v51, 27  ;;  %vm1258_vm6 = vcmp.lt.s32.totalorder %v2195_v51, 4  ;;  %vm1259_vm7 = vcmp.ge.s32.totalorder %v2195_v51, 12 }
 0xf30   :  { %vm2207_vm5 = vmand %vm1265_vm3, %vm1266_vm4  ;;  %vm1260_vm8 = vcmp.lt.s32.totalorder %v2195_v51, 20  ;;  %vm1262_vm10 = vcmp.ge.s32.totalorder %v2195_v51, 20  ;;  %vm1263_vm11 = vcmp.lt.s32.totalorder %v2195_v51, 24 }
 0xf31   :  { %vm2272_vm9 = vmand %vm1259_vm7, %vm1260_vm8 }
 0xf32   :  { %vm2430_vm12 = vmand %vm1262_vm10, %vm1263_vm11 }
 0xf9b   :  { %v880_v61 = vpop.permute.xlu0 %879 }
 0xf9c   :  { %v882_v63 = vmul.f32 %v880_v61, %v876_v12 }
 0xf9e   :  { %884 = vrot.lane.b32.xlu1 %v882_v63, %s1877_s29 }
0x1010   :  { %v885_v0 = vpop.permute.xlu1 %884 }
0x1011   :  { %v887_v3 = vadd.f32 %v885_v0, %v877_v14 }
0x1013   :  { %1775 = vtanh.f32 %v887_v3 }
0x1020   :  { %v1776_v62 = vpop.eup %1775 }
0x1021   :  { %890 = vrot.lane.b32.xlu0 %v1776_v62, %s1876_s1 }
0x1093   :  { %v891_v4 = vpop.permute.xlu0 %890 }
0x1094   :  { %v893_v5 = vmul.f32 %v891_v4, %v876_v12 }
0x1096   :  { %895 = vrot.lane.b32.xlu1 %v893_v5, %s1877_s29 }
0x1108   :  { %v896_v6 = vpop.permute.xlu1 %895 }
0x1109   :  { %899 = vst.msk [vmem:[#allocation3 + $0x28] sm:$0xff] %vm153_vm2, %v896_v6  ;;  %1702 = vmatmul.mubr.msk.f32.vlgmr.msra.gmra.mxu1 %vm153_vm2, %v896_v6 }
0x110a   :  { %1716 = vmatpush3.msra.mxu1 %v1119_v15  ;;  %1723 = vmatprep.mubr.msk.f32.mxu1 %vm153_vm2, %v1108_v8 }
0x110b   :  { %1717 = vmatprep.subr.mxu1 %v1118_v7 }
0x110c   :  { %1718 = vmatpush3.msra.mxu1 %v1118_v7 }
0x110d   :  { %1719 = vmatprep.subr.mxu1 %v1117_v9 }
0x110e   :  { %1720 = vmatpush3.msra.mxu1 %v1117_v9 }
0x110f   :  { %1721 = vmatprep.subr.mxu1 %v1116_v11 }
0x1110   :  { %1722 = vmatpush3.msra.mxu1 %v1116_v11  ;;  %v1113_v19 = vld [vmem:[#allocation3 + $0x28] sm:$0xff] }
0x1111   :  { %1724 = vmatmul.mubr.msk.f32.vlgmr.msra.gmra.mxu1 %vm153_vm2, %v1109_v13 }
0x1112   :  { %1726 = vmatprep.mubr.msk.f32.mxu1 %vm153_vm2, %v1110_v16 }
0x1115   :  { %1727 = vmatmul.mubr.msk.f32.gmra.mxu1 %vm153_vm2, %v1111_v17 }
0x1116   :  { %1729 = vmatprep.mubr.msk.f32.mxu1 %vm153_vm2, %v1112_v18 }
0x1119   :  { %1730 = vmatmul.mubr.msk.f32.gmra.mxu1 %vm153_vm2, %v1113_v19 }
0x11c9   :  { %v970_v21 = vpop.f32.mrf.mxu1 }
0x11ca   :  { %v974_v22 = vadd.f32 %v970_v21, %v275_v20 }
0x11cb   :  { %v1703_v25 = vpop.f32.mrf.mxu1 }
0x11cc   :  { %1777 = vtanh.f32 %v974_v22 }
0x11d1   :  { %v1725_v1 = vpop.f32.mrf.mxu1 }
0x11d2   :  { %v2230_v63 = vadd.f32 %v1725_v1, %v2200_v53 }
0x11d3   :  { %v1217_v50 = vpop.f32.mrf.mxu1 }
0x11d4   :  { %v2205_v54 = vadd.f32 %v2200_v53, %v1217_v50  ;;  %v1269_v0 = vsel %vm1258_vm6, %v2230_v63, -1e+30  ;;  %v1293_v7 = vsel %vm2207_vm5, %v2230_v63, -1e+30 }
0x11d5   :  { %v1728_v52 = vpop.f32.mrf.mxu1 }
0x11d6   :  { %v1292_v10 = vsel %vm2207_vm5, %v2205_v54, -1e+30  ;;  %v2218_v58 = vadd.f32 %v1728_v52, %v2200_v53  ;;  %v1268_v9 = vsel %vm1258_vm6, %v2205_v54, -1e+30 }
0x11d7   :  { %v1227_v55 = vpop.f32.mrf.mxu1 }
0x11d8   :  { %v2212_v57 = vadd.f32 %v2200_v53, %v1227_v55  ;;  %v1295_v61 = vsel %vm2207_vm5, %v2218_v58, -1e+30 }
0x11d9   :  { %v1778_v26 = vpop.eup %1777  ;;  %v1731_v60 = vpop.f32.mrf.mxu1 }
0x11da   :  { %980 = vrot.lane.b32.xlu0 %v1778_v26, %s1876_s1  ;;  %v976_v27 = vadd.f32 1.0, %v1778_v26  ;;  %v1294_v59 = vsel %vm2207_vm5, %v2212_v57, -1e+30  ;;  %v2224_v12 = vadd.f32 %v1731_v60, %v2200_v53  ;;  %v1270_v11 = vsel %vm1258_vm6, %v2212_v57, -1e+30 }
0x11db   :  { %v1237_v5 = vpop.f32.mrf.mxu1 }
0x11dc   :  { %v977_v28 = vmul.f32 0.5, %v976_v27  ;;  %v1297_v14 = vsel %vm2207_vm5, %v2224_v12, -1e+30  ;;  %v1273_v15 = vsel %vm1258_vm6, %v2224_v12, -1e+30  ;;  %v2247_v6 = vadd.f32 %v2200_v53, %v1237_v5 }
0x11de   :  { %v978_v31 = vmul.f32 %v977_v28, %v887_v3  ;;  %v1271_v3 = vsel %vm1258_vm6, %v2218_v58, -1e+30  ;;  %v1296_v8 = vsel %vm2207_vm5, %v2247_v6, -1e+30  ;;  %v1272_v13 = vsel %vm1258_vm6, %v2247_v6, -1e+30 }
0x11df   :  { %v1320_v49 = vsel %vm2272_vm9, 0.0, %v2247_v6 }
0x124c   :  { %v981_v29 = vpop.permute.xlu0 %980 }
0x124d   :  { %v983_v30 = vmul.f32 %v981_v29, %v977_v28  ;;  %v1317_v29 = vsel %vm2272_vm9, 0.0, %v2230_v63 }
0x124f   :  { %985 = vrot.lane.b32.xlu1 %v983_v30, %s1877_s29 }
0x12c1   :  { %v986_v32 = vpop.permute.xlu1 %985 }
0x12c2   :  { %v988_v33 = vadd.f32 %v986_v32, %v978_v31  ;;  %v1316_v32 = vsel %vm2272_vm9, 0.0, %v2205_v54 }
0x12c4   :  { %1779 = vtanh.f32 %v988_v33 }
0x12d1   :  { %v1780_v34 = vpop.eup %1779 }
0x12d2   :  { %991 = vrot.lane.b32.xlu0 %v1780_v34, %s1876_s1 }
0x1344   :  { %v992_v2 = vpop.permute.xlu0 %991 }
0x1345   :  { %v994_v35 = vmul.f32 %v992_v2, %v977_v28 }
0x1347   :  { %996 = vrot.lane.b32.xlu1 %v994_v35, %s1877_s29  ;;  %v1319_v35 = vsel %vm2272_vm9, 0.0, %v2218_v58 }
0x13b9   :  { %v997_v36 = vpop.permute.xlu1 %996 }
0x13ba   :  { %1000 = vst.msk [vmem:[#allocation3 + $0x30] sm:$0xff] %vm153_vm2, %v997_v36  ;;  %1713 = vmatmul.mubr.msk.f32.vlgmr.msra.gmra.mxu0 %vm153_vm2, %v997_v36 }
0x13c1   :  { %v1114_v37 = vld [vmem:[#allocation3 + $0x30] sm:$0xff] }
0x13c2   :  { %1732 = vmatprep.mubr.msk.f32.mxu1 %vm153_vm2, %v1114_v37 }
0x147a   :  { %v1071_v38 = vpop.f32.mrf.mxu0 }
0x147b   :  { %v1075_v39 = vadd.f32 %v1071_v38, %v280_v23  ;;  %v1318_v38 = vsel %vm2272_vm9, 0.0, %v2212_v57 }
0x147c   :  { %v1714_v40 = vpop.f32.mrf.mxu0 }
0x147d   :  { %1781 = vtanh.f32 %v1075_v39 }
0x148a   :  { %v1782_v41 = vpop.eup %1781 }
0x148b   :  { %1081 = vrot.lane.b32.xlu0 %v1782_v41, %s1876_s1  ;;  %v1077_v42 = vadd.f32 1.0, %v1782_v41 }
0x148d   :  { %v1078_v43 = vmul.f32 0.5, %v1077_v42 }
0x148f   :  { %v1079_v46 = vmul.f32 %v1078_v43, %v988_v33 }
0x14fd   :  { %v1082_v44 = vpop.permute.xlu0 %1081 }
0x14fe   :  { %v1084_v45 = vmul.f32 %v1082_v44, %v1078_v43 }
0x1500   :  { %1086 = vrot.lane.b32.xlu1 %v1084_v45, %s1877_s29 }
0x1572   :  { %v1087_v47 = vpop.permute.xlu1 %1086 }
0x1573   :  { %v2191_v48 = vadd.f32 %v1087_v47, %v1079_v46 }
0x1575   :  { %1783 = vtanh.f32 %v2191_v48 }
0x1582   :  { %v1784_v24 = vpop.eup %1783 }
0x1583   :  { %1092 = vrot.lane.b32.xlu0 %v1784_v24, %s1876_s1 }
0x15a2   :  { %1300 = vmax.xlane.f32.xlu0 %v1292_v10 }
0x15a6   :  { %1304 = vmax.xlane.f32.xlu0 %v1294_v59 }
0x15aa   :  { %1306 = vmax.xlane.f32.xlu0 %v1295_v61 }
0x15ae   :  { %1310 = vmax.xlane.f32.xlu0 %v1297_v14 }
0x15b2   :  { %1278 = vmax.xlane.f32.xlu0 %v1269_v0 }
0x15b6   :  { %1282 = vmax.xlane.f32.xlu0 %v1271_v3 }
0x15ba   :  { %1286 = vmax.xlane.f32.xlu0 %v1273_v15 }
0x15f5   :  { %v1093_v62 = vpop.permute.xlu0 %1092 }
0x15f6   :  { %v1095_v4 = vmul.f32 %v1093_v62, %v1078_v43  ;;  %v1321_v43 = vsel %vm2272_vm9, 0.0, %v2224_v12 }
0x15f8   :  { %1097 = vrot.lane.b32.xlu1 %v1095_v4, %s1877_s29 }
0x161c   :  { %1302 = vmax.xlane.f32.xlu1 %v1293_v7 }
0x1620   :  { %1308 = vmax.xlane.f32.xlu1 %v1296_v8 }
0x1624   :  { %1276 = vmax.xlane.f32.xlu1 %v1268_v9 }
0x1628   :  { %1280 = vmax.xlane.f32.xlu1 %v1270_v11 }
0x162b   :  { %v1301_v18 = vpop.xlane.xlu0 %1300 }
0x162c   :  { %1284 = vmax.xlane.f32.xlu1 %v1272_v13  ;;  %v1324_v34 = vsel %vm2207_vm5, %v1301_v18, %v1316_v32 }
0x162f   :  { %v1305_v19 = vpop.xlane.xlu0 %1304 }
0x1630   :  { %v1326_v40 = vsel %vm2207_vm5, %v1305_v19, %v1318_v38 }
0x1633   :  { %v1307_v20 = vpop.xlane.xlu0 %1306 }
0x1634   :  { %v1327_v37 = vsel %vm2207_vm5, %v1307_v20, %v1319_v35 }
0x1637   :  { %v1311_v22 = vpop.xlane.xlu0 %1310 }
0x1638   :  { %v1329_v45 = vsel %vm2207_vm5, %v1311_v22, %v1321_v43 }
0x163b   :  { %v1279_v27 = vpop.xlane.xlu0 %1278 }
0x163f   :  { %v1283_v31 = vpop.xlane.xlu0 %1282 }
0x1640   :  { %v1335_v39 = vsel %vm1258_vm6, %v1283_v31, %v1327_v37 }
0x1641   :  { %v1343_v46 = vsub.f32 %v2218_v58, %v1335_v39 }
0x1643   :  { %v1287_v41 = vpop.xlane.xlu0 %1286  ;;  %v1354_v59 = vmul.f32 1.442695, %v1343_v46 }
0x1644   :  { %v1337_v1 = vsel %vm1258_vm6, %v1287_v41, %v1329_v45 }
0x1645   :  { %v1345_v60 = vsub.f32 %v2224_v12, %v1337_v1 }
0x1647   :  { %v1358_v0 = vmul.f32 1.442695, %v1345_v60 }
0x166a   :  { %v1098_v16 = vpop.permute.xlu1 %1097 }
0x166b   :  { %1101 = vst.msk [vmem:[#allocation3 + $0x38] sm:$0xff] %vm153_vm2, %v1098_v16  ;;  %1102 = vst.msk [vmem:[%s2571_s10] sm:$0xff] %vm153_vm2, %v1098_v16 }
0x1672   :  { %v1115_v17 = vld [vmem:[#allocation3 + $0x38] sm:$0xff] }
0x1673   :  { %1733 = vmatmul.mubr.msk.f32.gmra.mxu1 %vm153_vm2, %v1115_v17 }
0x16a5   :  { %v1303_v21 = vpop.xlane.xlu1 %1302 }
0x16a6   :  { %v1325_v30 = vsel %vm2207_vm5, %v1303_v21, %v1317_v29 }
0x16a7   :  { %v1333_v33 = vsel %vm1258_vm6, %v1279_v27, %v1325_v30 }
0x16a8   :  { %v1341_v23 = vsub.f32 %v2230_v63, %v1333_v33 }
0x16a9   :  { %v1309_v25 = vpop.xlane.xlu1 %1308 }
0x16aa   :  { %v1350_v47 = vmul.f32 1.442695, %v1341_v23  ;;  %v1328_v50 = vsel %vm2207_vm5, %v1309_v25, %v1320_v49 }
0x16ac   :  { %1785 = vpow2.f32 %v1350_v47 }
0x16ad   :  { %v1277_v28 = vpop.xlane.xlu1 %1276 }
0x16ae   :  { %v1332_v36 = vsel %vm1258_vm6, %v1277_v28, %v1324_v34 }
0x16af   :  { %v1340_v42 = vsub.f32 %v2205_v54, %v1332_v36 }
0x16b1   :  { %v1281_v2 = vpop.xlane.xlu1 %1280  ;;  %v1348_v52 = vmul.f32 1.442695, %v1340_v42 }
0x16b2   :  { %v1334_v44 = vsel %vm1258_vm6, %v1281_v2, %v1326_v40 }
0x16b3   :  { %v1342_v55 = vsub.f32 %v2212_v57, %v1334_v44  ;;  %1787 = vpow2.f32 %v1348_v52 }
0x16b4   :  { %1789 = vpow2.f32 %v1354_v59 }
0x16b5   :  { %v1285_v24 = vpop.xlane.xlu1 %1284  ;;  %v1352_v61 = vmul.f32 1.442695, %v1342_v55 }
0x16b6   :  { %v1336_v10 = vsel %vm1258_vm6, %v1285_v24, %v1328_v50 }
0x16b7   :  { %v1344_v14 = vsub.f32 %v2247_v6, %v1336_v10  ;;  %1791 = vpow2.f32 %v1352_v61 }
0x16b8   :  { %1793 = vpow2.f32 %v1358_v0 }
0x16b9   :  { %v1356_v15 = vmul.f32 1.442695, %v1344_v14  ;;  %v2339_v11 = vpop.eup %1785 }
0x16ba   :  { %v1389_v16 = vsel %vm2207_vm5, %v2339_v11, 0.0  ;;  %v1365_v29 = vsel %vm1258_vm6, %v2339_v11, 0.0 }
0x16bb   :  { %1795 = vpow2.f32 %v1356_v15 }
0x16c0   :  { %v2344_v13 = vpop.eup %1787 }
0x16c1   :  { %v2349_v17 = vpop.eup %1789  ;;  %v1388_v18 = vsel %vm2207_vm5, %v2344_v13, 0.0  ;;  %v1364_v30 = vsel %vm1258_vm6, %v2344_v13, 0.0 }
0x16c2   :  { %v1391_v20 = vsel %vm2207_vm5, %v2349_v17, 0.0  ;;  %v1367_v31 = vsel %vm1258_vm6, %v2349_v17, 0.0 }
0x16c4   :  { %v2354_v19 = vpop.eup %1791 }
0x16c5   :  { %v2359_v21 = vpop.eup %1793  ;;  %v1390_v22 = vsel %vm2207_vm5, %v2354_v19, 0.0  ;;  %v1366_v32 = vsel %vm1258_vm6, %v2354_v19, 0.0 }
0x16c6   :  { %v1393_v27 = vsel %vm2207_vm5, %v2359_v21, 0.0  ;;  %v1369_v33 = vsel %vm1258_vm6, %v2359_v21, 0.0 }
0x16c8   :  { %v2364_v25 = vpop.eup %1795 }
0x16c9   :  { %v1392_v28 = vsel %vm2207_vm5, %v2364_v25, 0.0  ;;  %v1368_v34 = vsel %vm1258_vm6, %v2364_v25, 0.0 }
0x1733   :  { %v1734_v3 = vpop.f32.mrf.mxu1 }
0x1734   :  { %v2325_v62 = vadd.f32 %v1734_v3, %v2200_v53 }
0x1735   :  { %v1247_v4 = vpop.f32.mrf.mxu1 }
0x1736   :  { %v2328_v5 = vadd.f32 %v2200_v53, %v1247_v4  ;;  %v1299_v7 = vsel %vm2207_vm5, %v2325_v62, -1e+30  ;;  %v1275_v9 = vsel %vm1258_vm6, %v2325_v62, -1e+30  ;;  %v1323_v36 = vsel %vm2272_vm9, 0.0, %v2325_v62 }
0x1737   :  { %1314 = vmax.xlane.f32.xlu0 %v1299_v7 }
0x1738   :  { %v1298_v8 = vsel %vm2207_vm5, %v2328_v5, -1e+30  ;;  %v1274_v53 = vsel %vm1258_vm6, %v2328_v5, -1e+30  ;;  %v1322_v38 = vsel %vm2272_vm9, 0.0, %v2328_v5 }
0x1739   :  { %1312 = vmax.xlane.f32.xlu1 %v1298_v8 }
0x173b   :  { %1290 = vmax.xlane.f32.xlu0 %v1275_v9 }
0x173d   :  { %1288 = vmax.xlane.f32.xlu1 %v1274_v53 }
0x173f   :  { %1398 = vadd.xlane.f32.xlu0 %v1389_v16 }
0x1741   :  { %1396 = vadd.xlane.f32.xlu1 %v1388_v18 }
0x1743   :  { %1402 = vadd.xlane.f32.xlu0 %v1391_v20 }
0x1745   :  { %1400 = vadd.xlane.f32.xlu1 %v1390_v22 }
0x1747   :  { %1406 = vadd.xlane.f32.xlu0 %v1393_v27 }
0x1749   :  { %1404 = vadd.xlane.f32.xlu1 %v1392_v28 }
0x174b   :  { %1374 = vadd.xlane.f32.xlu0 %v1365_v29 }
0x174d   :  { %1372 = vadd.xlane.f32.xlu1 %v1364_v30 }
0x174f   :  { %1378 = vadd.xlane.f32.xlu0 %v1367_v31 }
0x1751   :  { %1376 = vadd.xlane.f32.xlu1 %v1366_v32 }
0x1753   :  { %1382 = vadd.xlane.f32.xlu0 %v1369_v33 }
0x1755   :  { %1380 = vadd.xlane.f32.xlu1 %v1368_v34 }
0x17c0   :  { %v1315_v2 = vpop.xlane.xlu0 %1314 }
0x17c1   :  { %v1331_v37 = vsel %vm2207_vm5, %v1315_v2, %v1323_v36 }
0x17c2   :  { %v1313_v35 = vpop.xlane.xlu1 %1312 }
0x17c3   :  { %v1330_v40 = vsel %vm2207_vm5, %v1313_v35, %v1322_v38 }
0x17c4   :  { %v1291_v23 = vpop.xlane.xlu0 %1290 }
0x17c5   :  { %v1339_v39 = vsel %vm1258_vm6, %v1291_v23, %v1331_v37 }
0x17c6   :  { %v1347_v41 = vsub.f32 %v2325_v62, %v1339_v39  ;;  %v1289_v42 = vpop.xlane.xlu1 %1288 }
0x17c7   :  { %v1338_v43 = vsel %vm1258_vm6, %v1289_v42, %v1330_v40 }
0x17c8   :  { %v1362_v44 = vmul.f32 1.442695, %v1347_v41  ;;  %v1346_v45 = vsub.f32 %v2328_v5, %v1338_v43  ;;  %v1399_v46 = vpop.xlane.xlu0 %1398 }
0x17ca   :  { %1797 = vpow2.f32 %v1362_v44  ;;  %v1360_v47 = vmul.f32 1.442695, %v1346_v45  ;;  %v1397_v24 = vpop.xlane.xlu1 %1396 }
0x17cc   :  { %1799 = vpow2.f32 %v1360_v47  ;;  %v1403_v1 = vpop.xlane.xlu0 %1402 }
0x17cd   :  { %1801 = vtanh.f32 %v2230_v63 }
0x17ce   :  { %1803 = vtanh.f32 %v2205_v54  ;;  %v1401_v49 = vpop.xlane.xlu1 %1400 }
0x17cf   :  { %1805 = vtanh.f32 %v2218_v58 }
0x17d0   :  { %1807 = vrcp.f32 %v1399_v46  ;;  %v1407_v50 = vpop.xlane.xlu0 %1406 }
0x17d1   :  { %1809 = vtanh.f32 %v2212_v57 }
0x17d2   :  { %1811 = vrcp.f32 %v1397_v24  ;;  %v1405_v52 = vpop.xlane.xlu1 %1404 }
0x17d3   :  { %1813 = vtanh.f32 %v2224_v12 }
0x17d4   :  { %1815 = vrcp.f32 %v1403_v1  ;;  %v1375_v55 = vpop.xlane.xlu0 %1374 }
0x17d5   :  { %1817 = vrcp.f32 %v1375_v55 }
0x17d6   :  { %1819 = vrcp.f32 %v1401_v49  ;;  %v1373_v10 = vpop.xlane.xlu1 %1372 }
0x17d7   :  { %v2411_v59 = vpop.eup %1797  ;;  %1821 = vrcp.f32 %v1373_v10 }
0x17d8   :  { %1823 = vrcp.f32 %v1407_v50  ;;  %v1379_v60 = vpop.xlane.xlu0 %1378  ;;  %v1395_v61 = vsel %vm2207_vm5, %v2411_v59, 0.0  ;;  %v1371_v9 = vsel %vm1258_vm6, %v2411_v59, 0.0 }
0x17d9   :  { %v2416_v14 = vpop.eup %1799  ;;  %1825 = vrcp.f32 %v1379_v60  ;;  %1410 = vadd.xlane.f32.xlu0 %v1395_v61 }
0x17da   :  { %v1802_v0 = vpop.eup %1801  ;;  %1827 = vrcp.f32 %v1405_v52  ;;  %v1377_v3 = vpop.xlane.xlu1 %1376  ;;  %v1394_v15 = vsel %vm2207_vm5, %v2416_v14, 0.0  ;;  %v1370_v20 = vsel %vm1258_vm6, %v2416_v14, 0.0 }
0x17db   :  { %v1804_v4 = vpop.eup %1803  ;;  %1829 = vrcp.f32 %v1377_v3  ;;  %1408 = vadd.xlane.f32.xlu1 %v1394_v15  ;;  %v1453_v32 = vsel %vm2430_vm12, %v1802_v0, %v2230_v63 }
0x17dc   :  { %v1806_v7 = vpop.eup %1805  ;;  %1831 = vtanh.f32 %v2247_v6  ;;  %v1383_v8 = vpop.xlane.xlu0 %1382  ;;  %v1461_v2 = vsel %vm2272_vm9, %v2339_v11, %v1453_v32  ;;  %v1452_v37 = vsel %vm2430_vm12, %v1804_v4, %v2205_v54 }
0x17dd   :  { %v1808_v53 = vpop.eup %1807  ;;  %1833 = vrcp.f32 %v1383_v8  ;;  %1386 = vadd.xlane.f32.xlu0 %v1371_v9  ;;  %v1460_v39 = vsel %vm2272_vm9, %v2344_v13, %v1452_v37  ;;  %v1455_v54 = vsel %vm2430_vm12, %v1806_v7, %v2218_v58 }
0x17de   :  { %v1810_v16 = vpop.eup %1809  ;;  %v1381_v18 = vpop.xlane.xlu1 %1380  ;;  %v1431_v29 = vmul.f32 %v1808_v53, %v2339_v11  ;;  %v1463_v45 = vsel %vm2272_vm9, %v2349_v17, %v1455_v54 }
0x17df   :  { %v1812_v22 = vpop.eup %1811  ;;  %1835 = vrcp.f32 %v1381_v18  ;;  %1384 = vadd.xlane.f32.xlu1 %v1370_v20  ;;  %v1454_v47 = vsel %vm2430_vm12, %v1810_v16, %v2212_v57 }
0x17e0   :  { %v1814_v28 = vpop.eup %1813  ;;  %v1429_v33 = vmul.f32 %v1812_v22, %v2344_v13  ;;  %v1469_v23 = vsel %vm2207_vm5, %v1431_v29, %v1461_v2  ;;  %v1462_v50 = vsel %vm2272_vm9, %v2354_v19, %v1454_v47 }
0x17e1   :  { %v1816_v30 = vpop.eup %1815  ;;  %v1457_v55 = vsel %vm2430_vm12, %v1814_v28, %v2224_v12 }
0x17e2   :  { %v1818_v31 = vpop.eup %1817  ;;  %v1435_v38 = vmul.f32 %v1816_v30, %v2349_v17  ;;  %v1468_v42 = vsel %vm2207_vm5, %v1429_v33, %v1460_v39  ;;  %v1465_v61 = vsel %vm2272_vm9, %v2359_v21, %v1457_v55 }
0x17e3   :  { %v1820_v34 = vpop.eup %1819  ;;  %v1415_v35 = vmul.f32 %v1818_v31, %v2339_v11 }
0x17e4   :  { %v1822_v36 = vpop.eup %1821  ;;  %v1433_v43 = vmul.f32 %v1820_v34, %v2354_v19  ;;  %v1471_v24 = vsel %vm2207_vm5, %v1435_v38, %v1463_v45 }
0x17e5   :  { %v1824_v63 = vpop.eup %1823  ;;  %v1477_v40 = vsel %vm1258_vm6, %v1415_v35, %v1469_v23  ;;  %v1413_v11 = vmul.f32 %v1822_v36, %v2344_v13 }
0x17e6   :  { %v1826_v41 = vpop.eup %1825  ;;  %1485 = vst [vmem:[%s2570_s9 + $0x8] sm:$0xff] %v1477_v40  ;;  %v1439_v1 = vmul.f32 %v1824_v63, %v2359_v21  ;;  %v1470_v10 = vsel %vm2207_vm5, %v1433_v43, %v1462_v50 }
0x17e7   :  { %v1828_v44 = vpop.eup %1827  ;;  %v1476_v13 = vsel %vm1258_vm6, %v1413_v11, %v1468_v42  ;;  %v1419_v46 = vmul.f32 %v1826_v41, %v2349_v17 }
0x17e8   :  { %v1830_v58 = vpop.eup %1829  ;;  %1484 = vst [vmem:[%s2570_s9] sm:$0xff] %v1476_v13  ;;  %v1437_v60 = vmul.f32 %v1828_v44, %v2364_v25  ;;  %v1473_v15 = vsel %vm2207_vm5, %v1439_v1, %v1465_v61 }
0x17e9   :  { %v1832_v49 = vpop.eup %1831  ;;  %v1479_v17 = vsel %vm1258_vm6, %v1419_v46, %v1471_v24  ;;  %v1417_v52 = vmul.f32 %v1830_v58, %v2354_v19 }
0x17ea   :  { %v1834_v57 = vpop.eup %1833  ;;  %1487 = vst [vmem:[%s2570_s9 + $0x18] sm:$0xff] %v1479_v17  ;;  %v1456_v12 = vsel %vm2430_vm12, %v1832_v49, %v2247_v6 }
0x17eb   :  { %v1478_v19 = vsel %vm1258_vm6, %v1417_v52, %v1470_v10  ;;  %v1423_v0 = vmul.f32 %v1834_v57, %v2359_v21  ;;  %v1464_v4 = vsel %vm2272_vm9, %v2364_v25, %v1456_v12 }
0x17ec   :  { %v1836_v3 = vpop.eup %1835  ;;  %1486 = vst [vmem:[%s2570_s9 + $0x10] sm:$0xff] %v1478_v19  ;;  %v1472_v8 = vsel %vm2207_vm5, %v1437_v60, %v1464_v4 }
0x17ed   :  { %v1481_v7 = vsel %vm1258_vm6, %v1423_v0, %v1473_v15  ;;  %v1421_v21 = vmul.f32 %v1836_v3, %v2364_v25 }
0x17ee   :  { %1489 = vst [vmem:[%s2570_s9 + $0x28] sm:$0xff] %v1481_v7 }
0x17ef   :  { %v1480_v6 = vsel %vm1258_vm6, %v1421_v21, %v1472_v8 }
0x17f0   :  { %1488 = vst [vmem:[%s2570_s9 + $0x20] sm:$0xff] %v1480_v6  ;;  %1104 = vrot.lane.b32.xlu1 %v2191_v48, %s1878_s13 }
0x1862   :  { %v1411_v9 = vpop.xlane.xlu0 %1410 }
0x1863   :  { %1837 = vrcp.f32 %v1411_v9 }
0x1864   :  { %1839 = vtanh.f32 %v2325_v62  ;;  %v1409_v25 = vpop.xlane.xlu1 %1408 }
0x1865   :  { %1841 = vrcp.f32 %v1409_v25 }
0x1866   :  { %1843 = vtanh.f32 %v2328_v5  ;;  %v1387_v53 = vpop.xlane.xlu0 %1386 }
0x1867   :  { %1845 = vrcp.f32 %v1387_v53 }
0x1868   :  { %v1385_v16 = vpop.xlane.xlu1 %1384 }
0x1869   :  { %1847 = vrcp.f32 %v1385_v16 }
0x186c   :  { %v1105_v18 = vpop.permute.xlu1 %1104 }
0x186d   :  { %1107 = vst.msk [vmem:[%s2572_s11] sm:$0xff] %vm153_vm2, %v1105_v18 }
0x1870   :  { %v1838_v20 = vpop.eup %1837 }
0x1871   :  { %v1840_v48 = vpop.eup %1839  ;;  %v1443_v28 = vmul.f32 %v1838_v20, %v2411_v59 }
0x1872   :  { %v1842_v22 = vpop.eup %1841  ;;  %v1459_v31 = vsel %vm2430_vm12, %v1840_v48, %v2325_v62 }
0x1873   :  { %v1844_v29 = vpop.eup %1843  ;;  %v1441_v32 = vmul.f32 %v1842_v22, %v2416_v14  ;;  %v1467_v33 = vsel %vm2272_vm9, %v2411_v59, %v1459_v31 }
0x1874   :  { %v1846_v30 = vpop.eup %1845  ;;  %v1458_v35 = vsel %vm2430_vm12, %v1844_v29, %v2328_v5  ;;  %v1475_v36 = vsel %vm2207_vm5, %v1443_v28, %v1467_v33 }
0x1875   :  { %v1427_v34 = vmul.f32 %v1846_v30, %v2411_v59  ;;  %v1466_v62 = vsel %vm2272_vm9, %v2416_v14, %v1458_v35 }
0x1876   :  { %v1848_v2 = vpop.eup %1847  ;;  %v1474_v59 = vsel %vm2207_vm5, %v1441_v32, %v1466_v62 }
0x1877   :  { %v1483_v37 = vsel %vm1258_vm6, %v1427_v34, %v1475_v36  ;;  %v1425_v23 = vmul.f32 %v1848_v2, %v2416_v14 }
0x1878   :  { %1491 = vst [vmem:[%s2570_s9 + $0x38] sm:$0xff] %v1483_v37 }
0x1879   :  { %v1482_v5 = vsel %vm1258_vm6, %v1425_v23, %v1474_v59 }
0x187a   :  { %1490 = vst [vmem:[%s2570_s9 + $0x30] sm:$0xff] %v1482_v5 }
0x187b   :  { %1504 = vsyncpa [#allocation5], 1 }

</bundles_post_ra>
